<compile_context>
chip_gen: v7x
topology: tpu7x:2x2x1
jax: 0.10.0
libtpu: 0.0.40
codegen_flags: <defaults>
</compile_context>

<pallas_src>
import numpy as np

import jax
import jax.numpy as jnp
from jax import lax
from jax.experimental import pallas as pl
from jax.experimental.pallas import tpu as pltpu


_HIGHEST = jax.lax.Precision.HIGHEST


# ----------------------------------------------------------------------------
# Bilinear interpolation matrix (PyTorch align_corners=False, antialias=False),
# built with numpy at trace time -> baked constant.
# ----------------------------------------------------------------------------
def _bilinear_matrix_np(out_size, in_size):
    if out_size == in_size:
        return np.eye(in_size, dtype=np.float32)
    scale = in_size / out_size
    dst = np.arange(out_size, dtype=np.float64)
    src = np.maximum((dst + 0.5) * scale - 0.5, 0.0)
    i0 = np.clip(np.floor(src).astype(np.int64), 0, in_size - 1)
    i1 = np.minimum(i0 + 1, in_size - 1)
    frac = (src - i0).astype(np.float32)
    m = np.zeros((out_size, in_size), dtype=np.float32)
    m[np.arange(out_size), i0] += 1.0 - frac
    m[np.arange(out_size), i1] += frac
    return m


# ----------------------------------------------------------------------------
# Kernel: per batch element, for every level do
#   z = Wc @ X + b                      (1x1 conv, lane-dense over Hi*Wi)
#   if (Hi,Wi)==(H0,W0):  store z       (resize is the identity -> skipped)
#   else:                 separable bilinear resize (W-pass, then H-pass)
# and store into that level's channel rows of the concatenated output.
# ----------------------------------------------------------------------------
def _make_fa_kernel(plans, H0, W0):
    def kernel(*refs):
        o_ref = refs[-1]                               # (C_total, H0*W0)
        r = 0
        for p in plans:
            C, Hi, Wi, c0 = p["C"], p["Hi"], p["Wi"], p["c_off"]
            x_ref, w_ref, b_ref = refs[r], refs[r + 1], refs[r + 2]
            r += 3

            # 1x1 conv: (C, C) @ (C, Hi*Wi), bias added on the VPU.
            z = jnp.dot(w_ref[...], x_ref[...],
                        precision=_HIGHEST,
                        preferred_element_type=jnp.float32)
            z = z + b_ref[...]                         # (C, 1) lane broadcast

            if p["identity"]:
                # Bilinear resize to the same size is exact identity -> skip.
                o_ref[c0:c0 + C, :] = z.astype(o_ref.dtype)
                continue

            wwT_ref, wh_ref = refs[r], refs[r + 1]
            r += 2

            # Lane-split (C, Hi*Wi) -> (C, Hi, Wi) with static lane slices
            # (avoids a lane-splitting vector reshape).
            z3 = jnp.stack([z[:, h * Wi:(h + 1) * Wi] for h in range(Hi)],
                           axis=1)                     # (C, Hi, Wi)

            # W-pass, batched over C: (C, Hi, Wi) @ (C, Wi, W0) -> (C, Hi, W0).
            wwT = jnp.broadcast_to(wwT_ref[...], (C, Wi, W0))
            t = lax.dot_general(z3, wwT, (((2,), (1,)), ((0,), (0,))),
                                precision=_HIGHEST,
                                preferred_element_type=jnp.float32)

            # H-pass, batched over C: (C, H0, Hi) @ (C, Hi, W0) -> (C, H0, W0).
            wh = jnp.broadcast_to(wh_ref[...], (C, H0, Hi))
            y3 = lax.dot_general(wh, t, (((2,), (1,)), ((0,), (0,))),
                                 precision=_HIGHEST,
                                 preferred_element_type=jnp.float32)

            # Lane-merge (C, H0, W0) -> (C, H0*W0) via lane-dim concat, then a
            # single lane-dense store into this level's channel rows.
            y = jnp.concatenate([y3[:, h, :] for h in range(H0)], axis=-1)
            o_ref[c0:c0 + C, :] = y.astype(o_ref.dtype)

    return kernel


# ----------------------------------------------------------------------------
# FeatureAggregator forward.
# ----------------------------------------------------------------------------
def feature_aggregator_forward(features, weights, biases):
    """features: list of (N, C_i, H_i, W_i); returns (N, sum C_i, H0, W0)."""
    N = int(features[0].shape[0])
    H0, W0 = int(features[0].shape[2]), int(features[0].shape[3])
    s_out = H0 * W0
    level_channels = [int(f.shape[1]) for f in features]
    c_total = sum(level_channels)

    kernel_inputs = []
    in_specs = []
    plans = []
    c_off = 0
    for x, w, b in zip(features, weights, biases):
        _, C, Hi, Wi = (int(d) for d in x.shape)
        s_in = Hi * Wi
        identity = (Hi == H0) and (Wi == W0)

        # Free metadata reshape: contiguous NCHW -> lane-dense (N, C, Hi*Wi).
        kernel_inputs.append(x.reshape(N, C, s_in))
        in_specs.append(
            pl.BlockSpec((pl.Squeezed(), C, s_in), lambda n: (n, 0, 0)))

        # Grid-invariant conv weight / bias: single-buffered.
        kernel_inputs.append(w)
        in_specs.append(
            pl.BlockSpec((C, C), lambda n: (0, 0),
                         pipeline_mode=pl.Buffered(1)))
        kernel_inputs.append(b[:, None])
        in_specs.append(
            pl.BlockSpec((C, 1), lambda n: (0, 0),
                         pipeline_mode=pl.Buffered(1)))

        if not identity:
            # Separable resize operands (tiny, grid-invariant, single-buffered).
            ww_t = _bilinear_matrix_np(W0, Wi).T        # (Wi, W0)
            wh = _bilinear_matrix_np(H0, Hi)            # (H0, Hi)
            kernel_inputs.append(jnp.asarray(ww_t))
            in_specs.append(
                pl.BlockSpec((Wi, W0), lambda n: (0, 0),
                             pipeline_mode=pl.Buffered(1)))
            kernel_inputs.append(jnp.asarray(wh))
            in_specs.append(
                pl.BlockSpec((H0, Hi), lambda n: (0, 0),
                             pipeline_mode=pl.Buffered(1)))

        plans.append(dict(C=C, Hi=Hi, Wi=Wi, c_off=c_off, identity=identity))
        c_off += C

    out_flat = pl.pallas_call(
        _make_fa_kernel(plans, H0, W0),
        out_shape=jax.ShapeDtypeStruct((N, c_total, s_out), jnp.float32),
        grid=(N,),
        in_specs=in_specs,
        out_specs=pl.BlockSpec((pl.Squeezed(), c_total, s_out),
                               lambda n: (n, 0, 0)),
        compiler_params=pltpu.CompilerParams(
            dimension_semantics=("parallel",),
            vmem_limit_bytes=32 * 1024 * 1024),
    )(*kernel_inputs)

    # Free metadata reshape back to NCHW.
    return out_flat.reshape(N, c_total, H0, W0)


# Pure-JAX reference (conv + separable bilinear + concat) used to verify the
# kernel; HIGHEST precision on both sides so the comparison is f32-accurate.
def _reference(features, weights, biases):
    H0, W0 = features[0].shape[2], features[0].shape[3]
    outs = []
    for x, w, b in zip(features, weights, biases):
        z = jnp.einsum("kc,nchw->nkhw", w, x,
                       precision=_HIGHEST) + b[None, :, None, None]
        wh = jnp.asarray(_bilinear_matrix_np(H0, x.shape[2]))
        ww = jnp.asarray(_bilinear_matrix_np(W0, x.shape[3]))
        y = jnp.einsum("ph,nchw,qw->ncpq", wh, z, ww, precision=_HIGHEST)
        outs.append(y)
    return jnp.concatenate(outs, axis=1)


if __name__ == "__main__":
    key = jax.random.PRNGKey(0)

    # Module config: two pyramid levels.
    in_channels_list = [4, 8]
    batch = 2
    spatial = [(16, 16), (8, 8)]  # features[0] defines the target size

    # Deterministic parameter init (shapes from nn.Conv2d(C, C, kernel_size=1)).
    weights, biases, features = [], [], []
    k = key
    for c, (h, wdim) in zip(in_channels_list, spatial):
        k, k1, k2, k3 = jax.random.split(k, 4)
        weights.append(jax.random.normal(k1, (c, c), dtype=jnp.float32) * 0.1)
        biases.append(jax.random.normal(k2, (c,), dtype=jnp.float32) * 0.1)
        features.append(jax.random.normal(k3, (batch, c, h, wdim),
                                          dtype=jnp.float32))

    out = feature_aggregator_forward(features, weights, biases)
    out = jax.block_until_ready(out)

    ref = jax.block_until_ready(_reference(features, weights, biases))

    assert out.shape == (batch, sum(in_channels_list), 16, 16), out.shape
    assert jnp.allclose(out, ref, rtol=1e-4, atol=1e-4), (
        float(jnp.max(jnp.abs(out - ref))))

    print("KERNEL_OK")
</pallas_src>

<mosaic_0001>
module attributes {stable_mosaic.version = 11 : i64} {
  func.func @kernel(%arg0: i32, %arg1: memref<1x4x256xf32, #tpu.memory_space<vmem>>, %arg2: memref<4x4xf32, #tpu.memory_space<vmem>>, %arg3: memref<4x1xf32, #tpu.memory_space<vmem>>, %arg4: memref<1x8x64xf32, #tpu.memory_space<vmem>>, %arg5: memref<8x8xf32, #tpu.memory_space<vmem>>, %arg6: memref<8x1xf32, #tpu.memory_space<vmem>>, %arg7: memref<8x16xf32, #tpu.memory_space<vmem>>, %arg8: memref<16x8xf32, #tpu.memory_space<vmem>>, %arg9: memref<1x12x256xf32, #tpu.memory_space<vmem>>) attributes {dimension_semantics = [#tpu.dimension_semantics<parallel>], iteration_bounds = array<i64: 2>, scalar_prefetch = 0 : i64, scratch_operands = 0 : i64, tpu.core_type = #tpu.core_type<tc>, window_params = [{transform_indices = @transform_0, window_bounds = array<i64: 1, 4, 256>}, {pipeline_mode = #tpu.pipeline_mode<synchronous>, transform_indices = @transform_1, window_bounds = array<i64: 4, 4>}, {pipeline_mode = #tpu.pipeline_mode<synchronous>, transform_indices = @transform_2, window_bounds = array<i64: 4, 1>}, {transform_indices = @transform_3, window_bounds = array<i64: 1, 8, 64>}, {pipeline_mode = #tpu.pipeline_mode<synchronous>, transform_indices = @transform_4, window_bounds = array<i64: 8, 8>}, {pipeline_mode = #tpu.pipeline_mode<synchronous>, transform_indices = @transform_5, window_bounds = array<i64: 8, 1>}, {pipeline_mode = #tpu.pipeline_mode<synchronous>, transform_indices = @transform_6, window_bounds = array<i64: 8, 16>}, {pipeline_mode = #tpu.pipeline_mode<synchronous>, transform_indices = @transform_7, window_bounds = array<i64: 16, 8>}, {transform_indices = @transform_8, window_bounds = array<i64: 1, 12, 256>}]} {
    %c0 = arith.constant 0 : index
    %c0_0 = arith.constant 0 : index
    %0 = vector.load %arg2[%c0, %c0_0] : memref<4x4xf32, #tpu.memory_space<vmem>>, vector<4x4xf32>
    %c0_1 = arith.constant 0 : index
    %c0_2 = arith.constant 0 : index
    %c0_3 = arith.constant 0 : index
    %1 = vector.load %arg1[%c0_1, %c0_2, %c0_3] : memref<1x4x256xf32, #tpu.memory_space<vmem>>, vector<1x4x256xf32>
    %2 = vector.shape_cast %1 : vector<1x4x256xf32> to vector<4x256xf32>
    %cst = arith.constant dense<0.000000e+00> : vector<4x256xf32>
    %3 = tpu.matmul %0, %2, %cst {dimension_numbers = #tpu.dot_dimension_numbers<[1], [0], [0], [1], [0, 0, 1, 1], [], []>, precision = #tpu.contract_precision<fp32>} : vector<4x4xf32>, vector<4x256xf32>, vector<4x256xf32> -> vector<4x256xf32>
    %c0_4 = arith.constant 0 : index
    %c0_5 = arith.constant 0 : index
    %4 = vector.load %arg3[%c0_4, %c0_5] : memref<4x1xf32, #tpu.memory_space<vmem>>, vector<4x1xf32>
    %5 = vector.broadcast %4 : vector<4x1xf32> to vector<4x256xf32>
    %6 = arith.addf %3, %5 : vector<4x256xf32>
    %c0_6 = arith.constant 0 : index
    %c0_7 = arith.constant 0 : index
    %c0_8 = arith.constant 0 : index
    %7 = vector.load %arg9[%c0_6, %c0_7, %c0_8] : memref<1x12x256xf32, #tpu.memory_space<vmem>>, vector<1x4x256xf32>
    %8 = vector.shape_cast %7 : vector<1x4x256xf32> to vector<4x256xf32>
    %9 = vector.shape_cast %6 : vector<4x256xf32> to vector<1x4x256xf32>
    tpu.vector_store %arg9[%c0_6, %c0_7, %c0_8], %9 {strides = array<i32>} : memref<1x12x256xf32, #tpu.memory_space<vmem>>, vector<1x4x256xf32>,
    %c0_9 = arith.constant 0 : index
    %c0_10 = arith.constant 0 : index
    %10 = vector.load %arg5[%c0_9, %c0_10] : memref<8x8xf32, #tpu.memory_space<vmem>>, vector<8x8xf32>
    %c0_11 = arith.constant 0 : index
    %c0_12 = arith.constant 0 : index
    %c0_13 = arith.constant 0 : index
    %11 = vector.load %arg4[%c0_11, %c0_12, %c0_13] : memref<1x8x64xf32, #tpu.memory_space<vmem>>, vector<1x8x64xf32>
    %12 = vector.shape_cast %11 : vector<1x8x64xf32> to vector<8x64xf32>
    %cst_14 = arith.constant dense<0.000000e+00> : vector<8x64xf32>
    %13 = tpu.matmul %10, %12, %cst_14 {dimension_numbers = #tpu.dot_dimension_numbers<[1], [0], [0], [1], [0, 0, 1, 1], [], []>, precision = #tpu.contract_precision<fp32>} : vector<8x8xf32>, vector<8x64xf32>, vector<8x64xf32> -> vector<8x64xf32>
    %c0_15 = arith.constant 0 : index
    %c0_16 = arith.constant 0 : index
    %14 = vector.load %arg6[%c0_15, %c0_16] : memref<8x1xf32, #tpu.memory_space<vmem>>, vector<8x1xf32>
    %15 = vector.broadcast %14 : vector<8x1xf32> to vector<8x64xf32>
    %16 = arith.addf %13, %15 : vector<8x64xf32>
    %17 = vector.extract_strided_slice %16 {offsets = [0, 0], sizes = [8, 8], strides = [1, 1]} : vector<8x64xf32> to vector<8x8xf32>
    %18 = vector.extract_strided_slice %16 {offsets = [0, 8], sizes = [8, 8], strides = [1, 1]} : vector<8x64xf32> to vector<8x8xf32>
    %19 = vector.extract_strided_slice %16 {offsets = [0, 16], sizes = [8, 8], strides = [1, 1]} : vector<8x64xf32> to vector<8x8xf32>
    %20 = vector.extract_strided_slice %16 {offsets = [0, 24], sizes = [8, 8], strides = [1, 1]} : vector<8x64xf32> to vector<8x8xf32>
    %21 = vector.extract_strided_slice %16 {offsets = [0, 32], sizes = [8, 8], strides = [1, 1]} : vector<8x64xf32> to vector<8x8xf32>
    %22 = vector.extract_strided_slice %16 {offsets = [0, 40], sizes = [8, 8], strides = [1, 1]} : vector<8x64xf32> to vector<8x8xf32>
    %23 = vector.extract_strided_slice %16 {offsets = [0, 48], sizes = [8, 8], strides = [1, 1]} : vector<8x64xf32> to vector<8x8xf32>
    %24 = vector.extract_strided_slice %16 {offsets = [0, 56], sizes = [8, 8], strides = [1, 1]} : vector<8x64xf32> to vector<8x8xf32>
    %25 = vector.shape_cast %17 : vector<8x8xf32> to vector<8x1x8xf32>
    %26 = vector.shape_cast %18 : vector<8x8xf32> to vector<8x1x8xf32>
    %27 = vector.shape_cast %19 : vector<8x8xf32> to vector<8x1x8xf32>
    %28 = vector.shape_cast %20 : vector<8x8xf32> to vector<8x1x8xf32>
    %29 = vector.shape_cast %21 : vector<8x8xf32> to vector<8x1x8xf32>
    %30 = vector.shape_cast %22 : vector<8x8xf32> to vector<8x1x8xf32>
    %31 = vector.shape_cast %23 : vector<8x8xf32> to vector<8x1x8xf32>
    %32 = vector.shape_cast %24 : vector<8x8xf32> to vector<8x1x8xf32>
    %33 = tpu.concatenate %25, %26, %27, %28, %29, %30, %31, %32 in 1 : vector<8x1x8xf32>, vector<8x1x8xf32>, vector<8x1x8xf32>, vector<8x1x8xf32>, vector<8x1x8xf32>, vector<8x1x8xf32>, vector<8x1x8xf32>, vector<8x1x8xf32> -> vector<8x8x8xf32>
    %c0_17 = arith.constant 0 : index
    %c0_18 = arith.constant 0 : index
    %34 = vector.load %arg7[%c0_17, %c0_18] : memref<8x16xf32, #tpu.memory_space<vmem>>, vector<8x16xf32>
    %35 = vector.shape_cast %34 : vector<8x16xf32> to vector<1x8x16xf32>
    %36 = vector.broadcast %35 : vector<1x8x16xf32> to vector<8x8x16xf32>
    %cst_19 = arith.constant dense<0.000000e+00> : vector<8x8x16xf32>
    %37 = tpu.matmul %33, %36, %cst_19 {dimension_numbers = #tpu.dot_dimension_numbers<[2], [1], [1], [2], [0, 0, 0, 1, 1, 2], [0], [0]>, precision = #tpu.contract_precision<fp32>} : vector<8x8x8xf32>, vector<8x8x16xf32>, vector<8x8x16xf32> -> vector<8x8x16xf32>
    %c0_20 = arith.constant 0 : index
    %c0_21 = arith.constant 0 : index
    %38 = vector.load %arg8[%c0_20, %c0_21] : memref<16x8xf32, #tpu.memory_space<vmem>>, vector<16x8xf32>
    %39 = vector.shape_cast %38 : vector<16x8xf32> to vector<1x16x8xf32>
    %40 = vector.broadcast %39 : vector<1x16x8xf32> to vector<8x16x8xf32>
    %cst_22 = arith.constant dense<0.000000e+00> : vector<8x16x16xf32>
    %41 = tpu.matmul %40, %37, %cst_22 {dimension_numbers = #tpu.dot_dimension_numbers<[2], [1], [1], [2], [0, 0, 0, 1, 1, 2], [0], [0]>, precision = #tpu.contract_precision<fp32>} : vector<8x16x8xf32>, vector<8x8x16xf32>, vector<8x16x16xf32> -> vector<8x16x16xf32>
    %42 = vector.extract_strided_slice %41 {offsets = [0, 0, 0], sizes = [8, 1, 16], strides = [1, 1, 1]} : vector<8x16x16xf32> to vector<8x1x16xf32>
    %43 = vector.shape_cast %42 : vector<8x1x16xf32> to vector<8x16xf32>
    %44 = vector.extract_strided_slice %41 {offsets = [0, 1, 0], sizes = [8, 1, 16], strides = [1, 1, 1]} : vector<8x16x16xf32> to vector<8x1x16xf32>
    %45 = vector.shape_cast %44 : vector<8x1x16xf32> to vector<8x16xf32>
    %46 = vector.extract_strided_slice %41 {offsets = [0, 2, 0], sizes = [8, 1, 16], strides = [1, 1, 1]} : vector<8x16x16xf32> to vector<8x1x16xf32>
    %47 = vector.shape_cast %46 : vector<8x1x16xf32> to vector<8x16xf32>
    %48 = vector.extract_strided_slice %41 {offsets = [0, 3, 0], sizes = [8, 1, 16], strides = [1, 1, 1]} : vector<8x16x16xf32> to vector<8x1x16xf32>
    %49 = vector.shape_cast %48 : vector<8x1x16xf32> to vector<8x16xf32>
    %50 = vector.extract_strided_slice %41 {offsets = [0, 4, 0], sizes = [8, 1, 16], strides = [1, 1, 1]} : vector<8x16x16xf32> to vector<8x1x16xf32>
    %51 = vector.shape_cast %50 : vector<8x1x16xf32> to vector<8x16xf32>
    %52 = vector.extract_strided_slice %41 {offsets = [0, 5, 0], sizes = [8, 1, 16], strides = [1, 1, 1]} : vector<8x16x16xf32> to vector<8x1x16xf32>
    %53 = vector.shape_cast %52 : vector<8x1x16xf32> to vector<8x16xf32>
    %54 = vector.extract_strided_slice %41 {offsets = [0, 6, 0], sizes = [8, 1, 16], strides = [1, 1, 1]} : vector<8x16x16xf32> to vector<8x1x16xf32>
    %55 = vector.shape_cast %54 : vector<8x1x16xf32> to vector<8x16xf32>
    %56 = vector.extract_strided_slice %41 {offsets = [0, 7, 0], sizes = [8, 1, 16], strides = [1, 1, 1]} : vector<8x16x16xf32> to vector<8x1x16xf32>
    %57 = vector.shape_cast %56 : vector<8x1x16xf32> to vector<8x16xf32>
    %58 = vector.extract_strided_slice %41 {offsets = [0, 8, 0], sizes = [8, 1, 16], strides = [1, 1, 1]} : vector<8x16x16xf32> to vector<8x1x16xf32>
    %59 = vector.shape_cast %58 : vector<8x1x16xf32> to vector<8x16xf32>
    %60 = vector.extract_strided_slice %41 {offsets = [0, 9, 0], sizes = [8, 1, 16], strides = [1, 1, 1]} : vector<8x16x16xf32> to vector<8x1x16xf32>
    %61 = vector.shape_cast %60 : vector<8x1x16xf32> to vector<8x16xf32>
    %62 = vector.extract_strided_slice %41 {offsets = [0, 10, 0], sizes = [8, 1, 16], strides = [1, 1, 1]} : vector<8x16x16xf32> to vector<8x1x16xf32>
    %63 = vector.shape_cast %62 : vector<8x1x16xf32> to vector<8x16xf32>
    %64 = vector.extract_strided_slice %41 {offsets = [0, 11, 0], sizes = [8, 1, 16], strides = [1, 1, 1]} : vector<8x16x16xf32> to vector<8x1x16xf32>
    %65 = vector.shape_cast %64 : vector<8x1x16xf32> to vector<8x16xf32>
    %66 = vector.extract_strided_slice %41 {offsets = [0, 12, 0], sizes = [8, 1, 16], strides = [1, 1, 1]} : vector<8x16x16xf32> to vector<8x1x16xf32>
    %67 = vector.shape_cast %66 : vector<8x1x16xf32> to vector<8x16xf32>
    %68 = vector.extract_strided_slice %41 {offsets = [0, 13, 0], sizes = [8, 1, 16], strides = [1, 1, 1]} : vector<8x16x16xf32> to vector<8x1x16xf32>
    %69 = vector.shape_cast %68 : vector<8x1x16xf32> to vector<8x16xf32>
    %70 = vector.extract_strided_slice %41 {offsets = [0, 14, 0], sizes = [8, 1, 16], strides = [1, 1, 1]} : vector<8x16x16xf32> to vector<8x1x16xf32>
    %71 = vector.shape_cast %70 : vector<8x1x16xf32> to vector<8x16xf32>
    %72 = vector.extract_strided_slice %41 {offsets = [0, 15, 0], sizes = [8, 1, 16], strides = [1, 1, 1]} : vector<8x16x16xf32> to vector<8x1x16xf32>
    %73 = vector.shape_cast %72 : vector<8x1x16xf32> to vector<8x16xf32>
    %74 = tpu.concatenate %43, %45, %47, %49, %51, %53, %55, %57, %59, %61, %63, %65, %67, %69, %71, %73 in 1 : vector<8x16xf32>, vector<8x16xf32>, vector<8x16xf32>, vector<8x16xf32>, vector<8x16xf32>, vector<8x16xf32>, vector<8x16xf32>, vector<8x16xf32>, vector<8x16xf32>, vector<8x16xf32>, vector<8x16xf32>, vector<8x16xf32>, vector<8x16xf32>, vector<8x16xf32>, vector<8x16xf32>, vector<8x16xf32> -> vector<8x256xf32>
    %c0_23 = arith.constant 0 : index
    %c4 = arith.constant 4 : index
    %c0_24 = arith.constant 0 : index
    %75 = vector.load %arg9[%c0_23, %c4, %c0_24] : memref<1x12x256xf32, #tpu.memory_space<vmem>>, vector<1x8x256xf32>
    %76 = vector.shape_cast %75 : vector<1x8x256xf32> to vector<8x256xf32>
    %77 = vector.shape_cast %74 : vector<8x256xf32> to vector<1x8x256xf32>
    tpu.vector_store %arg9[%c0_23, %c4, %c0_24], %77 {strides = array<i32>} : memref<1x12x256xf32, #tpu.memory_space<vmem>>, vector<1x8x256xf32>,
    return
  }
  func.func @transform_0(%arg0: i32) -> (i32, i32, i32) {
    %c0_i32 = arith.constant 0 : i32
    %c0_i32_0 = arith.constant 0 : i32
    %c0_i32_1 = arith.constant 0 : i32
    return %arg0, %c0_i32, %c0_i32_0 : i32, i32, i32
  }
  func.func @transform_1(%arg0: i32) -> (i32, i32) {
    %c0_i32 = arith.constant 0 : i32
    %c0_i32_0 = arith.constant 0 : i32
    %c0_i32_1 = arith.constant 0 : i32
    return %c0_i32, %c0_i32_0 : i32, i32
  }
  func.func @transform_2(%arg0: i32) -> (i32, i32) {
    %c0_i32 = arith.constant 0 : i32
    %c0_i32_0 = arith.constant 0 : i32
    %c0_i32_1 = arith.constant 0 : i32
    return %c0_i32, %c0_i32_0 : i32, i32
  }
  func.func @transform_3(%arg0: i32) -> (i32, i32, i32) {
    %c0_i32 = arith.constant 0 : i32
    %c0_i32_0 = arith.constant 0 : i32
    %c0_i32_1 = arith.constant 0 : i32
    return %arg0, %c0_i32, %c0_i32_0 : i32, i32, i32
  }
  func.func @transform_4(%arg0: i32) -> (i32, i32) {
    %c0_i32 = arith.constant 0 : i32
    %c0_i32_0 = arith.constant 0 : i32
    %c0_i32_1 = arith.constant 0 : i32
    return %c0_i32, %c0_i32_0 : i32, i32
  }
  func.func @transform_5(%arg0: i32) -> (i32, i32) {
    %c0_i32 = arith.constant 0 : i32
    %c0_i32_0 = arith.constant 0 : i32
    %c0_i32_1 = arith.constant 0 : i32
    return %c0_i32, %c0_i32_0 : i32, i32
  }
  func.func @transform_6(%arg0: i32) -> (i32, i32) {
    %c0_i32 = arith.constant 0 : i32
    %c0_i32_0 = arith.constant 0 : i32
    %c0_i32_1 = arith.constant 0 : i32
    return %c0_i32, %c0_i32_0 : i32, i32
  }
  func.func @transform_7(%arg0: i32) -> (i32, i32) {
    %c0_i32 = arith.constant 0 : i32
    %c0_i32_0 = arith.constant 0 : i32
    %c0_i32_1 = arith.constant 0 : i32
    return %c0_i32, %c0_i32_0 : i32, i32
  }
  func.func @transform_8(%arg0: i32) -> (i32, i32, i32) {
    %c0_i32 = arith.constant 0 : i32
    %c0_i32_0 = arith.constant 0 : i32
    %c0_i32_1 = arith.constant 0 : i32
    return %arg0, %c0_i32, %c0_i32_0 : i32, i32, i32
  }
}

</mosaic_0001>

<bundles_post_ra>
// kernel: tpu_custom_call.1
= control target key start
LH: loop header
LB: loop body
LE: loop exit
PB: predicated region body
PF: predicated region fallthrough
CT: control target
= control target key end

     0   :  { %13 = vsyncpa [#allocation3], 0  ;;  %s10613_s27 = smov 0   ;;  %s11612_s0 = inlined_call_operand.vmem [shape: f32[2,4,256], index: 0, kind: input, shape index: {}]   ;;  %s11613_s1 = inlined_call_operand.hbm [shape: f32[4,4], index: 1, kind: input, shape index: {}]   ;;  %s11614_s2 = inlined_call_operand.vmem [shape: f32[4,1], index: 2, kind: input, shape index: {}]   ;;  %s11615_s3 = inlined_call_operand.vmem [shape: f32[2,8,64], index: 3, kind: input, shape index: {}]   ;;  %s11616_s4 = inlined_call_operand.vmem [shape: f32[8,8], index: 4, kind: input, shape index: {}]   ;;  %s11617_s5 = inlined_call_operand.vmem [shape: f32[8,1], index: 5, kind: input, shape index: {}]   ;;  %s11618_s6 = inlined_call_operand.vmem [shape: f32[8,16], index: 6, kind: input, shape index: {}]   ;;  %s11619_s7 = inlined_call_operand.vmem [shape: f32[16,8], index: 7, kind: input, shape index: {}]   ;;  %s11620_s8 = inlined_call_operand.vmem [shape: f32[2,12,256], index: 8, kind: output, shape index: {}]  }
   0x1 LB: > { %s10619_s28 = sadd.s32 4294967295, %s10550_s27   ;;  %p9516_p0 = scmp.ge.s32.totalorder %s10550_s27, 1  ;;  %s10550_s27 = sphi %s10613_s27, %s19_s27  }
   0x2   : > { %p228_p1 = scmp.lt.s32.totalorder %s10550_s27, 3  ;;  %p11621_p3 = scmp.eq.s32.totalorder %s10619_s28, 0 }
   0x3   : > { %s10552_s30 = smov [#allocation2]   ;;  %s10512_s13 = scalar_lea.hbm %s11613_s1, 64 }
   0x4   : > { %p10623_p2 = pnand %p9516_p0, %p228_p1  ;;  %s241_s9 = sshll.u32 %s10552_s30, 4  ;;  %s242_s9 = int_to_ptr.vmem [resolvable:$true] %s241_s9 }
   0x5   : > { %p10513_p6 = scmp.ne.s32.totalorder %s11613_s1, %s10512_s13  ;;  %p10519_p10 = scmp.lt.u32.totalorder %s10512_s13, %s11613_s1 }
   0x6   : > { %s11623_s29 = scalar_select %p10623_p2, 1, 0 }
   0x7   : > { %p10479_p4 = pneg %p10623_p2 }
   0x9   : > { %p10632_p5 = pnand %p11621_p3, %p10479_p4 }
   0xb   : > { %p10514_p7 = pneg %p10632_p5 }
   0xd   : > { %p10515_p8 = pnand %p10514_p7, %p10513_p6 }
   0xf   : > { %p10516_p9 = pneg %p10515_p8 }
  0x11   : > { %p10521_p11 = pnand %p10519_p10, %p10516_p9 }
  0x13   : > { %10524 = shalt.err (!%p10521_p11)
}
  0x14   : > { %s10525_s18 = scalar_lea.vmem %s242_s9, 64  ;;  %p10533_p1 = scmp.lt.s32.totalorder %s242_s9, %s242_s9 }
  0x15   : > { %p10526_p12 = scmp.ne.s32.totalorder %s242_s9, %s10525_s18  ;;  %p10534_p4 = scmp.lt.s32.totalorder %s10525_s18, %s10525_s18 }
  0x17   : > { %p10528_p13 = pnand %p10526_p12, %p10514_p7  ;;  %p10535_p3 = por %p10534_p4, %p10533_p1 }
  0x19   : > { %p10529_p0 = pneg %p10528_p13 }
  0x1b   : > { %p10536_p2 = pnand %p10535_p3, %p10529_p0 }
  0x1d   : > { %10539 = shalt.err (!%p10536_p2)
}
  0x1e   : > { %10482 = dma.hbm_to_vmem [thread:$0]  (!%p10632_p5), %s11613_s1, 64, %s242_s9, [#allocation3]  }
  0x1f   : > { %p11625_p6 = scmp.ne.s32.totalorder %s11623_s29, 0 }
  0x20   : > { %p11626_p8 = scmp.eq.s32.totalorder (!%p11625_p6), %s10619_s28, 0 }
  0x21   : > { %284 = sbr.rel (%p11625_p6) target bundleno = 1252 (0x4e4), region = 52 }
  0x28   : > { %10545 = dma.done.wait (%p11626_p8), [#allocation3], 64   ;;  %p11627_p7 = pmov %p11626_p8 }
  0x29   : > { %p322_p9 = scmp.lt.s32.totalorder %s10619_s28, 1  ;;  %v10553_v0 = vmov 0.0   ;;  %vm10554_vm0 = vmmov 0   ;;  %v10555_v1 = vmov 0   ;;  %vm830_vm1 = vcmask 64512   ;;  %v822_v3 = vld [vmem:[%s11616_s4] sm:$0xff] }
  0x2a   : > { %10547 = vsyncadd (%p11627_p7), [#allocation3], 4294967232  ;;  %9782 = vmatprep.subr.mxu1 %v10553_v0  ;;  %9784 = vmatprep.mubr.msk.f32.mxu1 %vm10554_vm0, %v10553_v0  ;;  %v832_v5 = vsel %vm830_vm1, %v822_v3, 0  ;;  %v824_v6 = vld [vmem:[%s11617_s5] sm:$0xff]  ;;  %vm346_vm2 = vcmask 31744   ;;  %vm350_vm3 = vcmask 1043456   ;;  %v1285_v39 = vlaneseq }
  0x2b   : > { %s11629_s28 = smov (!%p322_p9, %s10619_s28), 1  ;;  %10509 = vset.pattern.permute.xlu0 %v10555_v1  ;;  %421 = vmatprep.mubr.f32.mxu0 %v10553_v0  ;;  %v900_v7 = vand.u32 4294901760, %v832_v5  ;;  %v336_v16 = vld [vmem:[#allocation2] sm:$0xf]  ;;  %v10556_v37 = vmov 1966171168  }
  0x2c   : > { %10510 = vset.pattern.permute.xlu1 %v10555_v1  ;;  %s9528_s21 = sshll.u32 %s11629_s28, 3  ;;  %827 = vperm.xlu0 %10509, %v824_v6   ;;  %v348_v17 = vsel %vm346_vm2, %v336_v16, 0  ;;  %v1283_v38 = vunpack.c.l.s4 %v10556_v37  ;;  %v1286_v41 = vshrl.u32 %v1285_v39, 7  ;;  %s10557_s12 = smov 112   ;;  %v10735_v54 = vld [vmem:[%s11618_s6] sm:$0xff]  ;;  %vm1538_vm4 = vcmask 1040384  }
  0x2d   : > { %s330_s24 = scalar_lea.vmem %s11615_s3, %s9528_s21  ;;  %v901_v9 = vsub.f32 %v832_v5, %v900_v7  ;;  %s326_s11 = scalar_lea.vmem %s11612_s0, %s9528_s21  ;;  %v422_v18 = vand.u32 4294901760, %v348_v17  ;;  %v10740_v55 = vand.u32 4294901760, %v10735_v54  ;;  %vm1547_vm5 = vcmask 1041408  }
  0x2e   : > { %v823_v2 = vld [vmem:[%s330_s24] sm:$0xff]  ;;  %v1284_v40 = vunpack.c.0.s8 %v1283_v38  ;;  %v10712_v48 = vsub.s32 0, %v1286_v41  ;;  %s10558_s13 = smov 120   ;;  %s10559_s14 = smov 104   ;;  %vm1556_vm6 = vcmask 1042432   ;;  %vm1573_vm7 = vcmask 1044480  }
  0x2f   : > { %v835_v4 = vand.u32 4294901760, %v823_v2  ;;  %v902_v11 = vand.u32 4294901760, %v901_v9  ;;  %v337_v19 = vld [vmem:[%s326_s11] sm:$0xff]  ;;  %v423_v20 = vsub.f32 %v348_v17, %v422_v18  ;;  %s10560_s15 = smov 96   ;;  %s10561_s16 = smov 88   ;;  %vm1582_vm8 = vcmask 1045504  }
  0x30   : > { %v345_v21 = vcombine.high %v337_v19, %v337_v19  ;;  %v351_v25 = vsel %vm350_vm3, %v337_v19, 0  ;;  %v1287_v43 = vsub.s32 %v1284_v40, %v1286_v41  ;;  %s10562_s19 = smov 80   ;;  %s10563_s20 = smov 72   ;;  %vm1591_vm9 = vcmask 1046528  }
  0x31   : > { %9783 = vmatpush3.msra.mxu1 %v835_v4  ;;  %v912_v8 = vsub.f32 %v823_v2, %v835_v4  ;;  %v903_v13 = vsub.f32 %v901_v9, %v902_v11  ;;  %v424_v22 = vand.u32 4294901760, %v423_v20  ;;  %v357_v27 = vand.u32 4294901760, %v351_v25  ;;  %s9529_s23 = sshll.u32 %s11629_s28, 5  ;;  %s10564_s10 = smov 16  }
  0x32   : > { %9787 = vmatprep.subr.mxu1 %v10553_v0  ;;  %v353_v23 = vsel %vm350_vm3, %v345_v21, 0  ;;  %s11087_s28 = scalar_lea.vmem %s11620_s8, %s9529_s23  ;;  %vm9122_vm10 = vcmask 1041409   ;;  %vm9125_vm11 = vcmask 1042434   ;;  %vm9128_vm12 = vcmask 1043459   ;;  %s10565_s11 = smov 32  }
  0x33   : > { %v913_v10 = vand.u32 4294901760, %v912_v8  ;;  %v904_v15 = vand.u32 4294901760, %v903_v13  ;;  %v355_v24 = vand.u32 4294901760, %v353_v23  ;;  %v425_v26 = vsub.f32 %v423_v20, %v424_v22 }
  0x34   : > { %v440_v30 = vsub.f32 %v351_v25, %v357_v27  ;;  %vm9131_vm13 = vcmask 1044484   ;;  %vm9134_vm14 = vcmask 1045509   ;;  %vm9137_vm15 = vcmask 1046534  }
  0x35   : > { %v914_v12 = vsub.f32 %v912_v8, %v913_v10  ;;  %9785 = vmatmul.mubr.f32.vlgmr.msra.gmra.mrb[0].mxu1 %v904_v15  ;;  %356 = vmatprep.subr.mxu0 %v355_v24  ;;  %v426_v28 = vand.u32 4294901760, %v425_v26  ;;  %v434_v29 = vsub.f32 %v353_v23, %v355_v24  ;;  %vm9406_vm2 = vcmask 261120  }
  0x36   : > { %9789 = vmatprep.mubr.msk.f32.mxu1 %vm10554_vm0, %v10553_v0  ;;  %358 = vmatpush1.msra.mxu0 %v357_v27  ;;  %v441_v32 = vand.u32 4294901760, %v440_v30 }
  0x37   : > { %v915_v14 = vand.u32 4294901760, %v914_v12  ;;  %427 = vmatmul.mubr.f32.vlgmr.msra.gmra.mrb[0].mxu0 %v426_v28  ;;  %v435_v31 = vand.u32 4294901760, %v434_v29 }
  0x38   : > { %507 = vmatprep.mubr.f32.mxu0 %v10553_v0  ;;  %v442_v34 = vsub.f32 %v440_v30, %v441_v32 }
  0x39   : > { %9788 = vmatpush3.msra.mxu1 %v915_v14  ;;  %v436_v33 = vsub.f32 %v434_v29, %v435_v31 }
  0x3a   : > { %9792 = vmatprep.subr.mxu1 %v10553_v0  ;;  %v443_v36 = vand.u32 4294901760, %v442_v34 }
  0x3b   : > { %v437_v35 = vand.u32 4294901760, %v436_v33 }
  0x3d   : > { %9790 = vmatmul.mubr.f32.vlgmr.msra.gmra.mrb[0].mxu1 %v900_v7  ;;  %438 = vmatprep.subr.mxu0 %v437_v35 }
  0x3e   : > { %9793 = vmatpush3.msra.mxu1 %v912_v8  ;;  %9794 = vmatprep.mubr.msk.f32.mxu1 %vm10554_vm0, %v10553_v0  ;;  %v338_v8 = vld [vmem:[%s11614_s2] sm:$0xf] }
  0x3f   : > { %9797 = vmatprep.subr.mxu1 %v10553_v0  ;;  %444 = vmatpush1.msra.mxu0 %v443_v36 }
  0x40   : > { %509 = vmatmul.mubr.f32.vlgmr.msra.gmra.mrb[0].mxu0 %v422_v18  ;;  %517 = vmatprep.subr.mxu0 %v434_v29 }
  0x41   : > { %520 = vmatpush1.msra.mxu0 %v440_v30  ;;  %583 = vmatprep.mubr.f32.mxu0 %v10553_v0  ;;  %v10838_v30 = vsub.f32 %v10735_v54, %v10740_v55 }
  0x42   : > { %593 = vmatprep.subr.mxu0 %v355_v24 }
  0x43   : > { %v10848_v40 = vand.u32 4294901760, %v10838_v30 }
  0x45   : > { %9795 = vmatmul.mubr.f32.vlgmr.msra.gmra.mrb[0].mxu1 %v901_v9 }
  0x46   : > { %9798 = vmatpush3.msra.mxu1 %v835_v4  ;;  %9799 = vmatprep.mubr.msk.f32.mxu1 %vm10554_vm0, %v10553_v0 }
  0x47   : > { %9802 = vmatprep.subr.mxu1 %v10553_v0 }
  0x48   : > { %586 = vmatmul.mubr.f32.vlgmr.msra.gmra.mrb[0].mxu0 %v423_v20 }
  0x49   : > { %595 = vmatpush1.msra.mxu0 %v357_v27  ;;  %658 = vmatprep.mubr.f32.mxu0 %v10553_v0 }
  0x4a   : > { %671 = vmatprep.subr.mxu0 %v435_v31 }
  0x4d   : > { %9800 = vmatmul.mubr.f32.vlgmr.msra.gmra.mrb[0].mxu1 %v902_v11 }
  0x4e   : > { %9803 = vmatpush3.msra.mxu1 %v913_v10  ;;  %9804 = vmatprep.mubr.msk.f32.mxu1 %vm10554_vm0, %v10553_v0 }
  0x4f   : > { %9807 = vmatprep.subr.mxu1 %v10553_v0 }
  0x50   : > { %662 = vmatmul.mubr.f32.vlgmr.msra.gmra.mrb[0].mxu0 %v424_v22 }
  0x51   : > { %675 = vmatpush1.msra.mxu0 %v441_v32  ;;  %738 = vmatprep.mubr.f32.mxu0 %v10553_v0 }
  0x52   : > { %747 = vmatprep.subr.mxu0 %v355_v24 }
  0x55   : > { %9805 = vmatmul.mubr.f32.vlgmr.msra.gmra.mrb[0].mxu1 %v900_v7 }
  0x56   : > { %9808 = vmatpush3.msra.mxu1 %v835_v4  ;;  %9809 = vmatprep.mubr.msk.f32.mxu1 %vm10554_vm0, %v10553_v0 }
  0x57   : > { %9842 = vmatprep.subr.mxu1 %v10553_v0 }
  0x58   : > { %740 = vmatmul.mubr.f32.vlgmr.msra.gmra.mrb[0].mxu0 %v422_v18 }
  0x59   : > { %749 = vmatpush1.msra.mxu0 %v357_v27  ;;  %812 = vmatprep.mubr.f32.mxu0 %v10553_v0 }
  0x5a   : > { %9812 = vmatprep.subr.mxu0 %v10553_v0 }
  0x5d   : > { %9810 = vmatmul.mubr.f32.vlgmr.msra.gmra.mrb[0].mxu1 %v900_v7 }
  0x5e   : > { %9844 = vmatprep.mubr.msk.f32.mxu1 %vm10554_vm0, %v10553_v0  ;;  %9843 = vmatpush3.msra.mxu1 %v10740_v55 }
  0x5f   : > { %9847 = vmatprep.subr.mxu1 %v10553_v0 }
  0x60   : > { %814 = vmatmul.mubr.f32.vlgmr.msra.gmra.mrb[0].mxu0 %v422_v18 }
  0x61   : > { %9814 = vmatprep.mubr.msk.f32.mxu0 %vm10554_vm0, %v10553_v0  ;;  %9813 = vmatpush3.msra.mxu0 %v10740_v55 }
  0x62   : > { %9817 = vmatprep.subr.mxu0 %v10553_v0 }
  0xab   : > { %v828_v42 = vpop.permute.xlu0 %827 }
 0x130   : > { %v1276_v44 = vpop.f32.mrb[0].mxu1 }
 0x131   : > { %v10294_v45 = vadd.f32 %v1276_v44, %v828_v42  ;;  %v9811_v46 = vpop.f32.mrb[1].mxu1 }
 0x133   : > { %v1288_v47 = vrot.slane %v10294_v45, %v1287_v43  ;;  %v1281_v60 = vcombine.high %v10294_v45, %v10294_v45 }
 0x135   : > { %v1296_v49 = vcombine.high %v1288_v47, %v1288_v47  ;;  %v10714_v50 = vrot.slane %v1288_v47, %v1287_v43  ;;  %v1295_v61 = vrot.slane %v1281_v60, %v1287_v43  ;;  %v1684_v47 = vsub.f32 %v10838_v30, %v10848_v40 }
 0x137   : > { %v10716_v51 = vrot.slane %v1296_v49, %v1287_v43  ;;  %v1341_v52 = vrot.slane %v10714_v50, %v10712_v48  ;;  %v10744_v56 = vcombine.high %v10714_v50, %v10714_v50  ;;  %v1297_v62 = vcombine.high %v1295_v61, %v1295_v61 }
 0x138   : > { %v10772_v63 = vrot.slane %v1295_v61, %v1287_v43  ;;  %v10866_v54 = vand.u32 4294901760, %v1684_v47 }
 0x139   : > { %1394 = vrot.lane.b32.xlu1 %v1341_v52, %s10557_s12  ;;  %1370 = vrot.lane.b32.xlu0 %v1341_v52, %s10558_s13  ;;  %v1345_v53 = vrot.slane %v10716_v51, %v10712_v48  ;;  %v10748_v57 = vcombine.high %v10716_v51, %v10716_v51  ;;  %v1349_v58 = vrot.slane %v10744_v56, %v10712_v48 }
 0x13a   : > { %v10774_v1 = vrot.slane %v1297_v62, %v1287_v43  ;;  %v1357_v2 = vrot.slane %v10772_v63, %v10712_v48  ;;  %v10796_v4 = vcombine.high %v10772_v63, %v10772_v63 }
 0x13b   : > { %v1353_v59 = vrot.slane %v10748_v57, %v10712_v48 }
 0x13c   : > { %v1361_v3 = vrot.slane %v10774_v1, %v10712_v48  ;;  %v10800_v5 = vcombine.high %v10774_v1, %v10774_v1  ;;  %v1365_v6 = vrot.slane %v10796_v4, %v10712_v48 }
 0x13d   : > { %1418 = vrot.lane.b32.xlu1 %v1341_v52, %s10559_s14  ;;  %1396 = vrot.lane.b32.xlu0 %v1345_v53, %s10557_s12 }
 0x13e   : > { %v1369_v7 = vrot.slane %v10800_v5, %v10712_v48 }
 0x141   : > { %1442 = vrot.lane.b32.xlu1 %v1341_v52, %s10560_s15  ;;  %1420 = vrot.lane.b32.xlu0 %v1345_v53, %s10559_s14 }
 0x145   : > { %1466 = vrot.lane.b32.xlu1 %v1341_v52, %s10561_s16  ;;  %1444 = vrot.lane.b32.xlu0 %v1345_v53, %s10560_s15 }
 0x149   : > { %1468 = vrot.lane.b32.xlu0 %v1345_v53, %s10561_s16  ;;  %1372 = vrot.lane.b32.xlu1 %v1345_v53, %s10558_s13 }
 0x14d   : > { %1492 = vrot.lane.b32.xlu0 %v1345_v53, %s10562_s19  ;;  %1490 = vrot.lane.b32.xlu1 %v1341_v52, %s10562_s19 }
 0x151   : > { %1516 = vrot.lane.b32.xlu0 %v1345_v53, %s10563_s20  ;;  %1514 = vrot.lane.b32.xlu1 %v1341_v52, %s10563_s20 }
 0x155   : > { %1374 = vrot.lane.b32.xlu1 %v1349_v58, %s10558_s13  ;;  %1376 = vrot.lane.b32.xlu0 %v1353_v59, %s10558_s13 }
 0x159   : > { %1398 = vrot.lane.b32.xlu1 %v1349_v58, %s10557_s12  ;;  %1400 = vrot.lane.b32.xlu0 %v1353_v59, %s10557_s12 }
 0x15d   : > { %1422 = vrot.lane.b32.xlu1 %v1349_v58, %s10559_s14  ;;  %1424 = vrot.lane.b32.xlu0 %v1353_v59, %s10559_s14 }
 0x161   : > { %1446 = vrot.lane.b32.xlu1 %v1349_v58, %s10560_s15  ;;  %1448 = vrot.lane.b32.xlu0 %v1353_v59, %s10560_s15 }
 0x165   : > { %1470 = vrot.lane.b32.xlu1 %v1349_v58, %s10561_s16  ;;  %1472 = vrot.lane.b32.xlu0 %v1353_v59, %s10561_s16 }
 0x169   : > { %1494 = vrot.lane.b32.xlu1 %v1349_v58, %s10562_s19  ;;  %1496 = vrot.lane.b32.xlu0 %v1353_v59, %s10562_s19 }
 0x16d   : > { %1518 = vrot.lane.b32.xlu1 %v1349_v58, %s10563_s20  ;;  %1520 = vrot.lane.b32.xlu0 %v1353_v59, %s10563_s20 }
 0x171   : > { %1378 = vrot.lane.b32.xlu1 %v1357_v2, %s10558_s13  ;;  %1380 = vrot.lane.b32.xlu0 %v1361_v3, %s10558_s13 }
 0x175   : > { %1402 = vrot.lane.b32.xlu1 %v1357_v2, %s10557_s12  ;;  %1404 = vrot.lane.b32.xlu0 %v1361_v3, %s10557_s12 }
 0x179   : > { %1426 = vrot.lane.b32.xlu1 %v1357_v2, %s10559_s14  ;;  %1428 = vrot.lane.b32.xlu0 %v1361_v3, %s10559_s14 }
 0x17d   : > { %1450 = vrot.lane.b32.xlu1 %v1357_v2, %s10560_s15  ;;  %1452 = vrot.lane.b32.xlu0 %v1361_v3, %s10560_s15 }
 0x181   : > { %1474 = vrot.lane.b32.xlu1 %v1357_v2, %s10561_s16  ;;  %1476 = vrot.lane.b32.xlu0 %v1361_v3, %s10561_s16 }
 0x185   : > { %1498 = vrot.lane.b32.xlu1 %v1357_v2, %s10562_s19  ;;  %1500 = vrot.lane.b32.xlu0 %v1361_v3, %s10562_s19 }
 0x189   : > { %1522 = vrot.lane.b32.xlu1 %v1357_v2, %s10563_s20  ;;  %1524 = vrot.lane.b32.xlu0 %v1361_v3, %s10563_s20 }
 0x18d   : > { %1382 = vrot.lane.b32.xlu1 %v1365_v6, %s10558_s13  ;;  %1384 = vrot.lane.b32.xlu0 %v1369_v7, %s10558_s13  ;;  %s10566_s13 = smov 48  }
 0x191   : > { %1406 = vrot.lane.b32.xlu1 %v1365_v6, %s10557_s12  ;;  %1408 = vrot.lane.b32.xlu0 %v1369_v7, %s10557_s12 }
 0x195   : > { %1430 = vrot.lane.b32.xlu1 %v1365_v6, %s10559_s14  ;;  %1432 = vrot.lane.b32.xlu0 %v1369_v7, %s10559_s14  ;;  %s10567_s14 = smov 64  }
 0x199   : > { %1454 = vrot.lane.b32.xlu1 %v1365_v6, %s10560_s15  ;;  %1456 = vrot.lane.b32.xlu0 %v1369_v7, %s10560_s15 }
 0x19d   : > { %1478 = vrot.lane.b32.xlu1 %v1365_v6, %s10561_s16  ;;  %1480 = vrot.lane.b32.xlu0 %v1369_v7, %s10561_s16 }
 0x1a1   : > { %1502 = vrot.lane.b32.xlu1 %v1365_v6, %s10562_s19  ;;  %1504 = vrot.lane.b32.xlu0 %v1369_v7, %s10562_s19 }
 0x1a5   : > { %1526 = vrot.lane.b32.xlu1 %v1365_v6, %s10563_s20  ;;  %1528 = vrot.lane.b32.xlu0 %v1369_v7, %s10563_s20 }
 0x1a9   : > { %341 = vperm.xlu1 %10510, %v338_v8  }
 0x1ab   : > { %v1395_v9 = vpop.permute.xlu1 %1394  ;;  %v1371_v10 = vpop.permute.xlu0 %1370 }
 0x1ac   : > { %v1539_v19 = vsel %vm1538_vm4, %v10714_v50, %v1371_v10 }
 0x1ad   : > { %v1548_v23 = vsel %vm1547_vm5, %v1539_v19, %v1395_v9 }
 0x1af   : > { %v1419_v11 = vpop.permute.xlu1 %1418  ;;  %v1397_v12 = vpop.permute.xlu0 %1396 }
 0x1b0   : > { %v1557_v27 = vsel %vm1556_vm6, %v1548_v23, %v1419_v11 }
 0x1b3   : > { %v1443_v13 = vpop.permute.xlu1 %1442  ;;  %v1421_v14 = vpop.permute.xlu0 %1420 }
 0x1b4   : > { %v1565_v29 = vsel %vm350_vm3, %v1557_v27, %v1443_v13 }
 0x1b7   : > { %v1467_v15 = vpop.permute.xlu1 %1466  ;;  %v1445_v16 = vpop.permute.xlu0 %1444 }
 0x1b8   : > { %v1574_v31 = vsel %vm1573_vm7, %v1565_v29, %v1467_v15 }
 0x1bb   : > { %v1469_v17 = vpop.permute.xlu0 %1468  ;;  %v1373_v18 = vpop.permute.xlu1 %1372 }
 0x1bc   : > { %v1540_v20 = vsel %vm1538_vm4, %v10716_v51, %v1373_v18 }
 0x1bd   : > { %v1549_v21 = vsel %vm1547_vm5, %v1540_v20, %v1397_v12 }
 0x1be   : > { %v1558_v22 = vsel %vm1556_vm6, %v1549_v21, %v1421_v14 }
 0x1bf   : > { %v1493_v24 = vpop.permute.xlu0 %1492  ;;  %v1566_v25 = vsel %vm350_vm3, %v1558_v22, %v1445_v16  ;;  %v1491_v26 = vpop.permute.xlu1 %1490 }
 0x1c0   : > { %v1575_v28 = vsel %vm1573_vm7, %v1566_v25, %v1469_v17  ;;  %v1583_v33 = vsel %vm1582_vm8, %v1574_v31, %v1491_v26 }
 0x1c1   : > { %v1584_v32 = vsel %vm1582_vm8, %v1575_v28, %v1493_v24 }
 0x1c3   : > { %v1517_v34 = vpop.permute.xlu0 %1516  ;;  %v1515_v35 = vpop.permute.xlu1 %1514 }
 0x1c4   : > { %v1593_v36 = vsel %vm1591_vm9, %v1584_v32, %v1517_v34  ;;  %v1592_v37 = vsel %vm1591_vm9, %v1583_v33, %v1515_v35 }
 0x1c5   : > { %v2051_v38 = vsel %vm830_vm1, %v1593_v36, 0  ;;  %v1602_v39 = vsel %vm830_vm1, %v1592_v37, 0 }
 0x1c6   : > { %v10850_v41 = vand.u32 4294901760, %v2051_v38  ;;  %v10852_v42 = vand.u32 4294901760, %v1602_v39 }
 0x1c7   : > { %v1375_v43 = vpop.permute.xlu1 %1374  ;;  %v1377_v44 = vpop.permute.xlu0 %1376 }
 0x1c8   : > { %v10855_v45 = vsub.f32 %v2051_v38, %v10850_v41  ;;  %v10858_v46 = vsub.f32 %v1602_v39, %v10852_v42  ;;  %v1541_v9 = vsel %vm1538_vm4, %v10744_v56, %v1375_v43  ;;  %v1542_v10 = vsel %vm1538_vm4, %v10748_v57, %v1377_v44 }
 0x1ca   : > { %v2121_v48 = vand.u32 4294901760, %v10855_v45  ;;  %v1672_v49 = vand.u32 4294901760, %v10858_v46 }
 0x1cb   : > { %v1399_v50 = vpop.permute.xlu1 %1398  ;;  %v1401_v51 = vpop.permute.xlu0 %1400 }
 0x1cc   : > { %v1673_v52 = vsub.f32 %v10858_v46, %v1672_v49  ;;  %v2122_v53 = vsub.f32 %v10855_v45, %v2121_v48  ;;  %v1550_v11 = vsel %vm1547_vm5, %v1541_v9, %v1399_v50  ;;  %v1551_v12 = vsel %vm1547_vm5, %v1542_v10, %v1401_v51 }
 0x1ce   : > { %v1674_v58 = vand.u32 4294901760, %v1673_v52  ;;  %v2123_v59 = vand.u32 4294901760, %v2122_v53 }
 0x1cf   : > { %v1423_v60 = vpop.permute.xlu1 %1422  ;;  %v1425_v61 = vpop.permute.xlu0 %1424 }
 0x1d0   : > { %9815 = vmatmul.mubr.f32.vlgmr.msra.gmra.mrb[2].mxu0 %v1674_v58  ;;  %9845 = vmatmul.mubr.f32.vlgmr.msra.gmra.mrb[2].mxu1 %v2123_v59  ;;  %v1559_v14 = vsel %vm1556_vm6, %v1550_v11, %v1423_v60  ;;  %v1560_v15 = vsel %vm1556_vm6, %v1551_v12, %v1425_v61 }
 0x1d1   : > { %9848 = vmatpush3.msra.mxu1 %v10866_v54  ;;  %9849 = vmatprep.mubr.msk.f32.mxu1 %vm10554_vm0, %v10553_v0 }
 0x1d2   : > { %9818 = vmatpush3.msra.mxu0 %v10866_v54  ;;  %9819 = vmatprep.mubr.msk.f32.mxu0 %vm10554_vm0, %v10553_v0 }
 0x1d3   : > { %v1447_v62 = vpop.permute.xlu1 %1446  ;;  %v1449_v2 = vpop.permute.xlu0 %1448  ;;  %9822 = vmatprep.subr.mxu0 %v10553_v0  ;;  %9852 = vmatprep.subr.mxu1 %v10553_v0 }
 0x1d4   : > { %v1567_v16 = vsel %vm350_vm3, %v1559_v14, %v1447_v62  ;;  %v1568_v56 = vsel %vm350_vm3, %v1560_v15, %v1449_v2 }
 0x1d7   : > { %v1471_v3 = vpop.permute.xlu1 %1470  ;;  %v1473_v6 = vpop.permute.xlu0 %1472 }
 0x1d8   : > { %9820 = vmatmul.mubr.f32.vlgmr.msra.gmra.mrb[2].mxu0 %v10852_v42  ;;  %9850 = vmatmul.mubr.f32.vlgmr.msra.gmra.mrb[2].mxu1 %v10850_v41  ;;  %v1576_v57 = vsel %vm1573_vm7, %v1567_v16, %v1471_v3  ;;  %v1577_v18 = vsel %vm1573_vm7, %v1568_v56, %v1473_v6 }
 0x1d9   : > { %9853 = vmatpush3.msra.mxu1 %v10838_v30  ;;  %9854 = vmatprep.mubr.msk.f32.mxu1 %vm10554_vm0, %v10553_v0 }
 0x1da   : > { %9823 = vmatpush3.msra.mxu0 %v10838_v30  ;;  %9824 = vmatprep.mubr.msk.f32.mxu0 %vm10554_vm0, %v10553_v0 }
 0x1db   : > { %v1495_v7 = vpop.permute.xlu1 %1494  ;;  %v1497_v8 = vpop.permute.xlu0 %1496  ;;  %9827 = vmatprep.subr.mxu0 %v10553_v0  ;;  %9857 = vmatprep.subr.mxu1 %v10553_v0 }
 0x1dc   : > { %v1585_v19 = vsel %vm1582_vm8, %v1576_v57, %v1495_v7  ;;  %v1586_v20 = vsel %vm1582_vm8, %v1577_v18, %v1497_v8 }
 0x1df   : > { %v1519_v13 = vpop.permute.xlu1 %1518  ;;  %v1521_v17 = vpop.permute.xlu0 %1520 }
 0x1e0   : > { %9825 = vmatmul.mubr.f32.vlgmr.msra.gmra.mrb[2].mxu0 %v10858_v46  ;;  %9855 = vmatmul.mubr.f32.vlgmr.msra.gmra.mrb[2].mxu1 %v10855_v45  ;;  %v1594_v22 = vsel %vm1591_vm9, %v1585_v19, %v1519_v13  ;;  %v1595_v23 = vsel %vm1591_vm9, %v1586_v20, %v1521_v17  ;;  %v10956_v45 = vpop.f32.mrb[0].mxu0 }
 0x1e1   : > { %9858 = vmatpush3.msra.mxu1 %v10740_v55  ;;  %9859 = vmatprep.mubr.msk.f32.mxu1 %vm10554_vm0, %v10553_v0  ;;  %v2500_v24 = vsel %vm830_vm1, %v1594_v22, 0  ;;  %v2949_v25 = vsel %vm830_vm1, %v1595_v23, 0  ;;  %v10960_v47 = vpop.f32.mrb[1].mxu0 }
 0x1e2   : > { %9828 = vmatpush3.msra.mxu0 %v10740_v55  ;;  %9829 = vmatprep.mubr.msk.f32.mxu0 %vm10554_vm0, %v10553_v0  ;;  %v10923_v28 = vand.u32 4294901760, %v2500_v24  ;;  %v10925_v29 = vand.u32 4294901760, %v2949_v25 }
 0x1e3   : > { %v10908_v21 = vpop.permute.xlu1 %1378  ;;  %9832 = vmatprep.subr.mxu0 %v10553_v0  ;;  %9862 = vmatprep.subr.mxu1 %v10553_v0  ;;  %v10918_v27 = vpop.permute.xlu0 %1380 }
 0x1e4   : > { %v10933_v32 = vsub.f32 %v2500_v24, %v10923_v28  ;;  %v10936_v33 = vsub.f32 %v2949_v25, %v10925_v29  ;;  %v1543_v58 = vsel %vm1538_vm4, %v10772_v63, %v10908_v21  ;;  %v1544_v59 = vsel %vm1538_vm4, %v10774_v1, %v10918_v27 }
 0x1e6   : > { %v2570_v36 = vand.u32 4294901760, %v10933_v32  ;;  %v3019_v37 = vand.u32 4294901760, %v10936_v33 }
 0x1e7   : > { %v10916_v26 = vpop.permute.xlu1 %1402  ;;  %v1405_v34 = vpop.permute.xlu0 %1404 }
 0x1e8   : > { %9830 = vmatmul.mubr.f32.vlgmr.msra.gmra.mrb[2].mxu0 %v1672_v49  ;;  %9860 = vmatmul.mubr.f32.vlgmr.msra.gmra.mrb[2].mxu1 %v2121_v48  ;;  %v2571_v43 = vsub.f32 %v10933_v32, %v2570_v36  ;;  %v3020_v44 = vsub.f32 %v10936_v33, %v3019_v37  ;;  %v1552_v60 = vsel %vm1547_vm5, %v1543_v58, %v10916_v26 }
 0x1e9   : > { %9863 = vmatpush3.msra.mxu1 %v10848_v40  ;;  %9864 = vmatprep.mubr.msk.f32.mxu1 %vm10554_vm0, %v10553_v0  ;;  %v1553_v61 = vsel %vm1547_vm5, %v1544_v59, %v1405_v34 }
 0x1ea   : > { %9833 = vmatpush3.msra.mxu0 %v10848_v40  ;;  %9834 = vmatprep.mubr.msk.f32.mxu0 %vm10554_vm0, %v10553_v0  ;;  %v2572_v48 = vand.u32 4294901760, %v2571_v43  ;;  %v3021_v49 = vand.u32 4294901760, %v3020_v44 }
 0x1eb   : > { %v1427_v31 = vpop.permute.xlu1 %1426  ;;  %9837 = vmatprep.subr.mxu0 %v10553_v0  ;;  %9867 = vmatprep.subr.mxu1 %v10553_v0  ;;  %v1429_v39 = vpop.permute.xlu0 %1428 }
 0x1ec   : > { %v1561_v62 = vsel %vm1556_vm6, %v1552_v60, %v1427_v31  ;;  %v1562_v2 = vsel %vm1556_vm6, %v1553_v61, %v1429_v39 }
 0x1ef   : > { %v1451_v35 = vpop.permute.xlu1 %1450  ;;  %v1453_v50 = vpop.permute.xlu0 %1452 }
 0x1f0   : > { %9835 = vmatmul.mubr.f32.vlgmr.msra.gmra.mrb[2].mxu0 %v10852_v42  ;;  %9865 = vmatmul.mubr.f32.vlgmr.msra.gmra.mrb[2].mxu1 %v10850_v41  ;;  %v1569_v63 = vsel %vm350_vm3, %v1561_v62, %v1451_v35  ;;  %v1570_v6 = vsel %vm350_vm3, %v1562_v2, %v1453_v50 }
 0x1f1   : > { %9868 = vmatpush3.msra.mxu1 %v10740_v55  ;;  %9869 = vmatprep.mubr.msk.f32.mxu1 %vm10554_vm0, %v10553_v0 }
 0x1f2   : > { %9838 = vmatpush3.msra.mxu0 %v10740_v55  ;;  %9839 = vmatprep.mubr.msk.f32.mxu0 %vm10554_vm0, %v10553_v0 }
 0x1f3   : > { %v1475_v38 = vpop.permute.xlu1 %1474  ;;  %9872 = vmatprep.subr.mxu0 %v10553_v0  ;;  %9902 = vmatprep.subr.mxu1 %v10553_v0 }
 0x1f4   : > { %v1578_v7 = vsel %vm1573_vm7, %v1569_v63, %v1475_v38 }
 0x1f7   : > { %v1499_v46 = vpop.permute.xlu1 %1498 }
 0x1f8   : > { %9870 = vmatmul.mubr.f32.vlgmr.msra.gmra.mrb[2].mxu1 %v10850_v41  ;;  %9840 = vmatmul.mubr.f32.vlgmr.msra.gmra.mrb[2].mxu0 %v10852_v42  ;;  %v1477_v42 = vpop.permute.xlu0 %1476  ;;  %v1587_v9 = vsel %vm1582_vm8, %v1578_v7, %v1499_v46 }
 0x1f9   : > { %9903 = vmatpush3.msra.mxu1 %v10740_v55  ;;  %9904 = vmatprep.mubr.msk.f32.mxu1 %vm10554_vm0, %v10553_v0  ;;  %v1579_v8 = vsel %vm1573_vm7, %v1570_v6, %v1477_v42 }
 0x1fa   : > { %9873 = vmatpush3.msra.mxu0 %v10740_v55  ;;  %9874 = vmatprep.mubr.msk.f32.mxu0 %vm10554_vm0, %v10553_v0 }
 0x1fb   : > { %v1523_v51 = vpop.permute.xlu1 %1522  ;;  %9877 = vmatprep.subr.mxu0 %v10553_v0  ;;  %9907 = vmatprep.subr.mxu1 %v10553_v0 }
 0x1fc   : > { %9875 = vmatmul.mubr.f32.vlgmr.msra.gmra.mrb[4].mxu0 %v2572_v48  ;;  %9905 = vmatmul.mubr.f32.vlgmr.msra.gmra.mrb[4].mxu1 %v3021_v49  ;;  %v1501_v53 = vpop.permute.xlu0 %1500  ;;  %v1596_v11 = vsel %vm1591_vm9, %v1587_v9, %v1523_v51 }
 0x1fd   : > { %9908 = vmatpush3.msra.mxu1 %v10866_v54  ;;  %9909 = vmatprep.mubr.msk.f32.mxu1 %vm10554_vm0, %v10553_v0  ;;  %v1588_v10 = vsel %vm1582_vm8, %v1579_v8, %v1501_v53  ;;  %v3398_v14 = vsel %vm830_vm1, %v1596_v11, 0 }
 0x1fe   : > { %9878 = vmatpush3.msra.mxu0 %v10866_v54  ;;  %9879 = vmatprep.mubr.msk.f32.mxu0 %vm10554_vm0, %v10553_v0  ;;  %v11036_v56 = vand.u32 4294901760, %v3398_v14 }
 0x1ff   : > { %9882 = vmatprep.subr.mxu0 %v10553_v0  ;;  %9912 = vmatprep.subr.mxu1 %v10553_v0  ;;  %v10978_v41 = vpop.permute.xlu1 %1382 }
 0x200   : > { %v1525_v1 = vpop.permute.xlu0 %1524  ;;  %v11048_v18 = vsub.f32 %v3398_v14, %v11036_v56 }
 0x201   : > { %v1597_v12 = vsel %vm1591_vm9, %v1588_v10, %v1525_v1  ;;  %v5194_v10 = vld [vmem:[%s11619_s7 + $0x8] sm:$0xff] }
 0x202   : > { %v3847_v15 = vsel %vm830_vm1, %v1597_v12, 0  ;;  %v3468_v21 = vand.u32 4294901760, %v11048_v18  ;;  %v5199_v11 = vsel %vm830_vm1, %v5194_v10, 0 }
 0x203   : > { %v10985_v52 = vpop.permute.xlu1 %1406  ;;  %v11038_v17 = vand.u32 4294901760, %v3847_v15 }
 0x204   : > { %9880 = vmatmul.mubr.f32.vlgmr.msra.gmra.mrb[4].mxu0 %v10923_v28  ;;  %9910 = vmatmul.mubr.f32.vlgmr.msra.gmra.mrb[4].mxu1 %v10925_v29  ;;  %v11031_v16 = vpop.permute.xlu0 %1384  ;;  %v3469_v25 = vsub.f32 %v11048_v18, %v3468_v21 }
 0x205   : > { %9913 = vmatpush3.msra.mxu1 %v10838_v30  ;;  %9914 = vmatprep.mubr.msk.f32.mxu1 %vm10554_vm0, %v10553_v0  ;;  %v11051_v19 = vsub.f32 %v3847_v15, %v11038_v17  ;;  %v1546_v38 = vsel %vm1538_vm4, %v10800_v5, %v11031_v16 }
 0x206   : > { %9883 = vmatpush3.msra.mxu0 %v10838_v30  ;;  %9884 = vmatprep.mubr.msk.f32.mxu0 %vm10554_vm0, %v10553_v0  ;;  %v3470_v31 = vand.u32 4294901760, %v3469_v25 }
 0x207   : > { %9887 = vmatprep.subr.mxu0 %v10553_v0  ;;  %9917 = vmatprep.subr.mxu1 %v10553_v0  ;;  %v11003_v3 = vpop.permute.xlu1 %1430  ;;  %v3917_v22 = vand.u32 4294901760, %v11051_v19 }
 0x208   : > { %v1409_v20 = vpop.permute.xlu0 %1408 }
 0x209   : > { %v3918_v26 = vsub.f32 %v11051_v19, %v3917_v22  ;;  %v1555_v43 = vsel %vm1547_vm5, %v1546_v38, %v1409_v20 }
 0x20b   : > { %v11023_v13 = vpop.permute.xlu1 %1454 }
 0x20c   : > { %9885 = vmatmul.mubr.f32.vlgmr.msra.gmra.mrb[4].mxu0 %v10933_v32  ;;  %9915 = vmatmul.mubr.f32.vlgmr.msra.gmra.mrb[4].mxu1 %v10936_v33  ;;  %v1433_v24 = vpop.permute.xlu0 %1432  ;;  %v3919_v32 = vand.u32 4294901760, %v3918_v26 }
 0x20d   : > { %9918 = vmatpush3.msra.mxu1 %v10740_v55  ;;  %9919 = vmatprep.mubr.msk.f32.mxu1 %vm10554_vm0, %v10553_v0 }
 0x20e   : > { %9888 = vmatpush3.msra.mxu0 %v10740_v55  ;;  %9889 = vmatprep.mubr.msk.f32.mxu0 %vm10554_vm0, %v10553_v0 }
 0x20f   : > { %9892 = vmatprep.subr.mxu0 %v10553_v0  ;;  %9922 = vmatprep.subr.mxu1 %v10553_v0  ;;  %v11045_v57 = vpop.permute.xlu1 %1478 }
 0x210   : > { %v1457_v33 = vpop.permute.xlu0 %1456 }
 0x213   : > { %v11060_v23 = vpop.permute.xlu1 %1502 }
 0x214   : > { %9890 = vmatmul.mubr.f32.vlgmr.msra.gmra.mrb[4].mxu0 %v2570_v36  ;;  %9920 = vmatmul.mubr.f32.vlgmr.msra.gmra.mrb[4].mxu1 %v3019_v37  ;;  %v1481_v35 = vpop.permute.xlu0 %1480  ;;  %v1545_v37 = vsel %vm1538_vm4, %v10796_v4, %v10978_v41  ;;  %vm9410_vm4 = vcmask 523264  }
 0x215   : > { %9893 = vmatpush3.msra.mxu0 %v10848_v40  ;;  %9894 = vmatprep.mubr.msk.f32.mxu0 %vm10554_vm0, %v10553_v0  ;;  %v1554_v39 = vsel %vm1547_vm5, %v1545_v37, %v10985_v52  ;;  %vm9412_vm5 = vcmask 654336  }
 0x216   : > { %9923 = vmatpush3.msra.mxu1 %v10848_v40  ;;  %9924 = vmatprep.mubr.msk.f32.mxu1 %vm10554_vm0, %v10553_v0  ;;  %v1563_v44 = vsel %vm1556_vm6, %v1554_v39, %v11003_v3 }
 0x217   : > { %9897 = vmatprep.subr.mxu0 %v10553_v0  ;;  %9927 = vmatprep.subr.mxu1 %v10553_v0  ;;  %v1527_v27 = vpop.permute.xlu1 %1526  ;;  %v1571_v4 = vsel %vm350_vm3, %v1563_v44, %v11023_v13 }
 0x218   : > { %v1505_v36 = vpop.permute.xlu0 %1504 }
 0x21c   : > { %9895 = vmatmul.mubr.f32.vlgmr.msra.gmra.mrb[4].mxu0 %v10923_v28  ;;  %9925 = vmatmul.mubr.f32.vlgmr.msra.gmra.mrb[4].mxu1 %v10925_v29  ;;  %v1529_v5 = vpop.permute.xlu0 %1528 }
 0x21d   : > { %9898 = vmatpush3.msra.mxu0 %v10740_v55  ;;  %9899 = vmatprep.mubr.msk.f32.mxu0 %vm10554_vm0, %v10553_v0 }
 0x21e   : > { %9928 = vmatpush3.msra.mxu1 %v10740_v55  ;;  %9929 = vmatprep.mubr.msk.f32.mxu1 %vm10554_vm0, %v10553_v0 }
 0x21f   : > { %9932 = vmatprep.subr.mxu0 %v10553_v0  ;;  %9962 = vmatprep.subr.mxu1 %v10553_v0 }
 0x224   : > { %9900 = vmatmul.mubr.f32.vlgmr.msra.gmra.mrb[4].mxu0 %v10923_v28  ;;  %9930 = vmatmul.mubr.f32.vlgmr.msra.gmra.mrb[4].mxu1 %v10925_v29 }
 0x225   : > { %9933 = vmatpush3.msra.mxu0 %v10740_v55  ;;  %9934 = vmatprep.mubr.msk.f32.mxu0 %vm10554_vm0, %v10553_v0 }
 0x226   : > { %9963 = vmatpush3.msra.mxu1 %v10740_v55  ;;  %9964 = vmatprep.mubr.msk.f32.mxu1 %vm10554_vm0, %v10553_v0 }
 0x227   : > { %9937 = vmatprep.subr.mxu0 %v10553_v0  ;;  %9967 = vmatprep.subr.mxu1 %v10553_v0 }
 0x228   : > { %9935 = vmatmul.mubr.f32.vlgmr.msra.gmra.mrb[6].mxu0 %v3470_v31  ;;  %9965 = vmatmul.mubr.f32.vlgmr.msra.gmra.mrb[6].mxu1 %v3919_v32  ;;  %v342_v28 = vpop.permute.xlu1 %341 }
 0x229   : > { %9938 = vmatpush3.msra.mxu0 %v10866_v54  ;;  %9939 = vmatprep.mubr.msk.f32.mxu0 %vm10554_vm0, %v10553_v0  ;;  %v10292_v29 = vadd.f32 %v10956_v45, %v342_v28  ;;  %v10293_v34 = vadd.f32 %v10960_v47, %v342_v28  ;;  %v1564_v45 = vsel %vm1556_vm6, %v1555_v43, %v1433_v24  ;;  %vm9414_vm6 = vcmask 785408  }
 0x22a   : > { %9968 = vmatpush3.msra.mxu1 %v10866_v54  ;;  %9969 = vmatprep.mubr.msk.f32.mxu1 %vm10554_vm0, %v10553_v0  ;;  %v1572_v46 = vsel %vm350_vm3, %v1564_v45, %v1457_v33  ;;  %v1580_v47 = vsel %vm1573_vm7, %v1571_v4, %v11045_v57  ;;  %vm9408_vm3 = vcmask 392192  }
 0x22b   : > { %9942 = vmatprep.subr.mxu0 %v10553_v0  ;;  %9972 = vmatprep.subr.mxu1 %v10553_v0  ;;  %820 = vst [vmem:[%s11087_s28] sm:$0xf] %v10292_v29  ;;  %821 = vst [vmem:[%s11087_s28 + $0x8] sm:$0xf] %v10293_v34  ;;  %v1581_v48 = vsel %vm1573_vm7, %v1572_v46, %v1481_v35  ;;  %v1589_v49 = vsel %vm1582_vm8, %v1580_v47, %v11060_v23  ;;  %vm9416_vm7 = vcmask 916480  }
 0x22c   : > { %v1590_v50 = vsel %vm1582_vm8, %v1581_v48, %v1505_v36  ;;  %v1598_v51 = vsel %vm1591_vm9, %v1589_v49, %v1527_v27 }
 0x22d   : > { %v1599_v41 = vsel %vm1591_vm9, %v1590_v50, %v1529_v5  ;;  %v4296_v42 = vsel %vm830_vm1, %v1598_v51, 0 }
 0x22e   : > { %v4745_v52 = vsel %vm830_vm1, %v1599_v41, 0  ;;  %v11153_v53 = vand.u32 4294901760, %v4296_v42 }
 0x22f   : > { %v11155_v58 = vand.u32 4294901760, %v4745_v52 }
 0x230   : > { %9940 = vmatmul.mubr.f32.vlgmr.msra.gmra.mrb[6].mxu0 %v11036_v56  ;;  %9970 = vmatmul.mubr.f32.vlgmr.msra.gmra.mrb[6].mxu1 %v11038_v17  ;;  %v4365_v59 = vsub.f32 %v4296_v42, %v11153_v53 }
 0x231   : > { %9943 = vmatpush3.msra.mxu0 %v10838_v30  ;;  %9944 = vmatprep.mubr.msk.f32.mxu0 %vm10554_vm0, %v10553_v0  ;;  %v4814_v60 = vsub.f32 %v4745_v52, %v11155_v58 }
 0x232   : > { %9973 = vmatpush3.msra.mxu1 %v10838_v30  ;;  %9974 = vmatprep.mubr.msk.f32.mxu1 %vm10554_vm0, %v10553_v0  ;;  %v4366_v61 = vand.u32 4294901760, %v4365_v59 }
 0x233   : > { %9947 = vmatprep.subr.mxu0 %v10553_v0  ;;  %9977 = vmatprep.subr.mxu1 %v10553_v0  ;;  %v4815_v62 = vand.u32 4294901760, %v4814_v60 }
 0x234   : > { %v4367_v2 = vsub.f32 %v4365_v59, %v4366_v61 }
 0x235   : > { %v4816_v3 = vsub.f32 %v4814_v60, %v4815_v62 }
 0x236   : > { %v4368_v63 = vand.u32 4294901760, %v4367_v2 }
 0x237   : > { %v4817_v6 = vand.u32 4294901760, %v4816_v3 }
 0x238   : > { %9945 = vmatmul.mubr.f32.vlgmr.msra.gmra.mrb[6].mxu0 %v11048_v18  ;;  %9975 = vmatmul.mubr.f32.vlgmr.msra.gmra.mrb[6].mxu1 %v11051_v19 }
 0x239   : > { %9948 = vmatpush3.msra.mxu0 %v10740_v55  ;;  %9949 = vmatprep.mubr.msk.f32.mxu0 %vm10554_vm0, %v10553_v0 }
 0x23a   : > { %9978 = vmatpush3.msra.mxu1 %v10740_v55  ;;  %9979 = vmatprep.mubr.msk.f32.mxu1 %vm10554_vm0, %v10553_v0 }
 0x23b   : > { %9952 = vmatprep.subr.mxu0 %v10553_v0  ;;  %9982 = vmatprep.subr.mxu1 %v10553_v0 }
 0x240   : > { %9950 = vmatmul.mubr.f32.vlgmr.msra.gmra.mrb[6].mxu0 %v3468_v21  ;;  %9980 = vmatmul.mubr.f32.vlgmr.msra.gmra.mrb[6].mxu1 %v3917_v22 }
 0x241   : > { %9953 = vmatpush3.msra.mxu0 %v10848_v40  ;;  %9954 = vmatprep.mubr.msk.f32.mxu0 %vm10554_vm0, %v10553_v0 }
 0x242   : > { %9983 = vmatpush3.msra.mxu1 %v10848_v40  ;;  %9984 = vmatprep.mubr.msk.f32.mxu1 %vm10554_vm0, %v10553_v0 }
 0x243   : > { %9957 = vmatprep.subr.mxu0 %v10553_v0  ;;  %9987 = vmatprep.subr.mxu1 %v10553_v0 }
 0x248   : > { %9955 = vmatmul.mubr.f32.vlgmr.msra.gmra.mrb[6].mxu0 %v11036_v56  ;;  %9985 = vmatmul.mubr.f32.vlgmr.msra.gmra.mrb[6].mxu1 %v11038_v17 }
 0x249   : > { %9958 = vmatpush3.msra.mxu0 %v10740_v55  ;;  %9959 = vmatprep.mubr.msk.f32.mxu0 %vm10554_vm0, %v10553_v0 }
 0x24a   : > { %9988 = vmatpush3.msra.mxu1 %v10740_v55  ;;  %9989 = vmatprep.mubr.msk.f32.mxu1 %vm10554_vm0, %v10553_v0 }
 0x24b   : > { %9992 = vmatprep.subr.mxu0 %v10553_v0  ;;  %10022 = vmatprep.subr.mxu1 %v10553_v0 }
 0x250   : > { %9960 = vmatmul.mubr.f32.vlgmr.msra.gmra.mrb[6].mxu0 %v11036_v56  ;;  %9990 = vmatmul.mubr.f32.vlgmr.msra.gmra.mrb[6].mxu1 %v11038_v17 }
 0x251   : > { %9993 = vmatpush3.msra.mxu0 %v10740_v55  ;;  %9994 = vmatprep.mubr.msk.f32.mxu0 %vm10554_vm0, %v10553_v0 }
 0x252   : > { %10023 = vmatpush3.msra.mxu1 %v10740_v55  ;;  %10024 = vmatprep.mubr.msk.f32.mxu1 %vm10554_vm0, %v10553_v0 }
 0x253   : > { %9997 = vmatprep.subr.mxu0 %v10553_v0  ;;  %10027 = vmatprep.subr.mxu1 %v10553_v0 }
 0x254   : > { %9995 = vmatmul.mubr.f32.vlgmr.msra.gmra.mrb[8].mxu0 %v4368_v63  ;;  %10025 = vmatmul.mubr.f32.vlgmr.msra.gmra.mrb[8].mxu1 %v4817_v6 }
 0x255   : > { %9998 = vmatpush3.msra.mxu0 %v10866_v54  ;;  %9999 = vmatprep.mubr.msk.f32.mxu0 %vm10554_vm0, %v10553_v0 }
 0x256   : > { %10028 = vmatpush3.msra.mxu1 %v10866_v54  ;;  %10029 = vmatprep.mubr.msk.f32.mxu1 %vm10554_vm0, %v10553_v0  ;;  %v5193_v54 = vld [vmem:[%s11619_s7] sm:$0xff] }
 0x257   : > { %10002 = vmatprep.subr.mxu0 %v10553_v0  ;;  %10032 = vmatprep.subr.mxu1 %v10553_v0 }
 0x25c   : > { %10000 = vmatmul.mubr.f32.vlgmr.msra.gmra.mrb[8].mxu0 %v11153_v53  ;;  %10030 = vmatmul.mubr.f32.vlgmr.msra.gmra.mrb[8].mxu1 %v11155_v58 }
 0x25d   : > { %10003 = vmatpush3.msra.mxu0 %v10838_v30  ;;  %10004 = vmatprep.mubr.msk.f32.mxu0 %vm10554_vm0, %v10553_v0 }
 0x25e   : > { %10033 = vmatpush3.msra.mxu1 %v10838_v30  ;;  %10034 = vmatprep.mubr.msk.f32.mxu1 %vm10554_vm0, %v10553_v0  ;;  %v5196_v30 = vsel %vm830_vm1, %v5193_v54, 0  ;;  %vm9404_vm1 = vcmask 130048  }
 0x25f   : > { %10007 = vmatprep.subr.mxu0 %v10553_v0  ;;  %10037 = vmatprep.subr.mxu1 %v10553_v0  ;;  %v11214_v1 = vand.u32 4294901760, %v5196_v30 }
 0x261   : > { %v11217_v7 = vsub.f32 %v5196_v30, %v11214_v1 }
 0x263   : > { %v11228_v8 = vand.u32 4294901760, %v11217_v7 }
 0x264   : > { %10005 = vmatmul.mubr.f32.vlgmr.msra.gmra.mrb[8].mxu0 %v4365_v59  ;;  %10035 = vmatmul.mubr.f32.vlgmr.msra.gmra.mrb[8].mxu1 %v4814_v60 }
 0x265   : > { %10008 = vmatpush3.msra.mxu0 %v10740_v55  ;;  %10009 = vmatprep.mubr.msk.f32.mxu0 %vm10554_vm0, %v10553_v0 }
 0x266   : > { %10038 = vmatpush3.msra.mxu1 %v10740_v55  ;;  %10039 = vmatprep.mubr.msk.f32.mxu1 %vm10554_vm0, %v10553_v0 }
 0x267   : > { %10012 = vmatprep.subr.mxu0 %v10553_v0  ;;  %10042 = vmatprep.subr.mxu1 %v10553_v0 }
 0x26c   : > { %10010 = vmatmul.mubr.f32.vlgmr.msra.gmra.mrb[8].mxu0 %v4366_v61  ;;  %10040 = vmatmul.mubr.f32.vlgmr.msra.gmra.mrb[8].mxu1 %v4815_v62 }
 0x26d   : > { %10013 = vmatpush3.msra.mxu0 %v10848_v40  ;;  %10014 = vmatprep.mubr.msk.f32.mxu0 %vm10554_vm0, %v10553_v0 }
 0x26e   : > { %10043 = vmatpush3.msra.mxu1 %v10848_v40  ;;  %10044 = vmatprep.mubr.msk.f32.mxu1 %vm10554_vm0, %v10553_v0  ;;  %v5270_v40 = vsub.f32 %v11217_v7, %v11228_v8 }
 0x26f   : > { %10017 = vmatprep.subr.mxu0 %v10553_v0  ;;  %10047 = vmatprep.subr.mxu1 %v10553_v0 }
 0x270   : > { %v11240_v9 = vand.u32 4294901760, %v5270_v40 }
 0x274   : > { %10015 = vmatmul.mubr.f32.vlgmr.msra.gmra.mrb[8].mxu0 %v11153_v53  ;;  %10045 = vmatmul.mubr.f32.vlgmr.msra.gmra.mrb[8].mxu1 %v11155_v58 }
 0x275   : > { %10018 = vmatpush3.msra.mxu0 %v10740_v55  ;;  %10019 = vmatprep.mubr.msk.f32.mxu0 %vm10554_vm0, %v10553_v0 }
 0x276   : > { %10048 = vmatpush3.msra.mxu1 %v10740_v55  ;;  %10049 = vmatprep.mubr.msk.f32.mxu1 %vm10554_vm0, %v10553_v0  ;;  %v11250_v55 = vand.u32 4294901760, %v5199_v11  ;;  %vm9140_vm0 = vcmask 1047559  }
 0x278   : > { %v11253_v0 = vsub.f32 %v5199_v11, %v11250_v55 }
 0x27a   : > { %v11256_v12 = vand.u32 4294901760, %v11253_v0 }
 0x27c   : > { %10020 = vmatmul.mubr.f32.vlgmr.msra.gmra.mrb[8].mxu0 %v11153_v53  ;;  %10050 = vmatmul.mubr.f32.vlgmr.msra.gmra.mrb[8].mxu1 %v11155_v58  ;;  %v5280_v13 = vsub.f32 %v11253_v0, %v11256_v12 }
 0x27d   : > { %10054 = vmatprep.mubr.f32.mxu0 %v11240_v9  ;;  %10084 = vmatprep.mubr.f32.mxu1 %v11240_v9 }
 0x27e   : > { %v11260_v18 = vand.u32 4294901760, %v5280_v13 }
 0x2cb   : > { %v2046_v14 = vpop.f32.mrb[2].mxu0  ;;  %v2495_v15 = vpop.f32.mrb[2].mxu1 }
 0x2cc   : > { %v5202_v16 = vand.u32 4294901760, %v2046_v14  ;;  %v5691_v56 = vand.u32 4294901760, %v2495_v15  ;;  %v9841_v17 = vpop.f32.mrb[3].mxu0  ;;  %v9871_v57 = vpop.f32.mrb[3].mxu1 }
 0x2ce   : > { %v5289_v19 = vsub.f32 %v2046_v14, %v5202_v16  ;;  %v5778_v20 = vsub.f32 %v2495_v15, %v5691_v56  ;;  %10052 = vmatprep.subr.mxu0 %v5202_v16  ;;  %10082 = vmatprep.subr.mxu1 %v5691_v56 }
 0x2cf   : > { %10053 = vmatpush3.msra.mxu0 %v5202_v16  ;;  %10083 = vmatpush3.msra.mxu1 %v5691_v56 }
 0x2d0   : > { %10055 = vmatmul.mubr.f32.vlgmr.msra.gmra.mrb[10].mxu0 %v11260_v18  ;;  %10085 = vmatmul.mubr.f32.vlgmr.msra.gmra.mrb[10].mxu1 %v11260_v18  ;;  %v5290_v21 = vand.u32 4294901760, %v5289_v19  ;;  %v5779_v22 = vand.u32 4294901760, %v5778_v20 }
 0x2d1   : > { %10059 = vmatprep.mubr.f32.mxu0 %v11214_v1  ;;  %10089 = vmatprep.mubr.f32.mxu1 %v11214_v1 }
 0x2d2   : > { %v5291_v23 = vsub.f32 %v5289_v19, %v5290_v21  ;;  %v5780_v24 = vsub.f32 %v5778_v20, %v5779_v22 }
 0x2d4   : > { %v5292_v25 = vand.u32 4294901760, %v5291_v23  ;;  %v5781_v26 = vand.u32 4294901760, %v5780_v24 }
 0x2d6   : > { %10057 = vmatprep.subr.mxu0 %v5292_v25  ;;  %10087 = vmatprep.subr.mxu1 %v5781_v26 }
 0x2d7   : > { %10058 = vmatpush3.msra.mxu0 %v5292_v25  ;;  %10088 = vmatpush3.msra.mxu1 %v5781_v26 }
 0x2d8   : > { %10060 = vmatmul.mubr.f32.vlgmr.msra.gmra.mrb[10].mxu0 %v11250_v55  ;;  %10062 = vmatprep.subr.mxu0 %v5289_v19 }
 0x2d9   : > { %10090 = vmatmul.mubr.f32.vlgmr.msra.gmra.mrb[10].mxu1 %v11250_v55  ;;  %10092 = vmatprep.subr.mxu1 %v5778_v20 }
 0x2da   : > { %10063 = vmatpush3.msra.mxu0 %v5289_v19  ;;  %10093 = vmatpush3.msra.mxu1 %v5778_v20 }
 0x2db   : > { %10067 = vmatprep.subr.mxu0 %v5202_v16  ;;  %10097 = vmatprep.subr.mxu1 %v5691_v56 }
 0x2dc   : > { %10064 = vmatprep.mubr.f32.mxu0 %v11217_v7  ;;  %10094 = vmatprep.mubr.f32.mxu1 %v11217_v7 }
 0x2e0   : > { %10065 = vmatmul.mubr.f32.vlgmr.msra.gmra.mrb[10].mxu0 %v11253_v0 }
 0x2e1   : > { %10068 = vmatpush3.msra.mxu0 %v5202_v16  ;;  %10095 = vmatmul.mubr.f32.vlgmr.msra.gmra.mrb[10].mxu1 %v11253_v0 }
 0x2e2   : > { %10098 = vmatpush3.msra.mxu1 %v5691_v56  ;;  %10072 = vmatprep.subr.mxu0 %v5290_v21 }
 0x2e3   : > { %10102 = vmatprep.subr.mxu1 %v5779_v22  ;;  %10069 = vmatprep.mubr.f32.mxu0 %v11228_v8 }
 0x2e4   : > { %10099 = vmatprep.mubr.f32.mxu1 %v11228_v8 }
 0x2e8   : > { %10070 = vmatmul.mubr.f32.vlgmr.msra.gmra.mrb[10].mxu0 %v11256_v12 }
 0x2e9   : > { %10073 = vmatpush3.msra.mxu0 %v5290_v21  ;;  %10100 = vmatmul.mubr.f32.vlgmr.msra.gmra.mrb[10].mxu1 %v11256_v12 }
 0x2ea   : > { %10103 = vmatpush3.msra.mxu1 %v5779_v22  ;;  %10077 = vmatprep.subr.mxu0 %v5202_v16 }
 0x2eb   : > { %10107 = vmatprep.subr.mxu1 %v5691_v56  ;;  %10074 = vmatprep.mubr.f32.mxu0 %v11214_v1 }
 0x2ec   : > { %10104 = vmatprep.mubr.f32.mxu1 %v11214_v1 }
 0x2f0   : > { %10075 = vmatmul.mubr.f32.vlgmr.msra.gmra.mrb[10].mxu0 %v11250_v55 }
 0x2f1   : > { %10078 = vmatpush3.msra.mxu0 %v5202_v16  ;;  %10105 = vmatmul.mubr.f32.vlgmr.msra.gmra.mrb[10].mxu1 %v11250_v55 }
 0x2f2   : > { %10108 = vmatpush3.msra.mxu1 %v5691_v56  ;;  %10079 = vmatprep.mubr.f32.mxu0 %v11214_v1 }
 0x2f3   : > { %10109 = vmatprep.mubr.f32.mxu1 %v11214_v1 }
 0x2f7   : > { %v2944_v27 = vpop.f32.mrb[4].mxu0  ;;  %v3393_v31 = vpop.f32.mrb[4].mxu1 }
 0x2f8   : > { %v6180_v32 = vand.u32 4294901760, %v2944_v27  ;;  %v6669_v33 = vand.u32 4294901760, %v3393_v31  ;;  %v9901_v28 = vpop.f32.mrb[5].mxu0  ;;  %v9931_v29 = vpop.f32.mrb[5].mxu1  ;;  %10080 = vmatmul.mubr.f32.vlgmr.msra.gmra.mrb[10].mxu0 %v11250_v55 }
 0x2f9   : > { %10110 = vmatmul.mubr.f32.vlgmr.msra.gmra.mrb[10].mxu1 %v11250_v55  ;;  %10114 = vmatprep.mubr.f32.mxu0 %v11240_v9 }
 0x2fa   : > { %v6267_v34 = vsub.f32 %v2944_v27, %v6180_v32  ;;  %v6756_v35 = vsub.f32 %v3393_v31, %v6669_v33  ;;  %10112 = vmatprep.subr.mxu0 %v6180_v32  ;;  %10142 = vmatprep.subr.mxu1 %v6669_v33 }
 0x2fb   : > { %10113 = vmatpush3.msra.mxu0 %v6180_v32  ;;  %10143 = vmatpush3.msra.mxu1 %v6669_v33 }
 0x2fc   : > { %10144 = vmatprep.mubr.f32.mxu1 %v11240_v9  ;;  %10115 = vmatmul.mubr.f32.vlgmr.msra.gmra.mrb[12].mxu0 %v11260_v18  ;;  %v6268_v36 = vand.u32 4294901760, %v6267_v34  ;;  %v6757_v37 = vand.u32 4294901760, %v6756_v35 }
 0x2fd   : > { %10145 = vmatmul.mubr.f32.vlgmr.msra.gmra.mrb[12].mxu1 %v11260_v18  ;;  %10119 = vmatprep.mubr.f32.mxu0 %v11214_v1 }
 0x2fe   : > { %v6269_v38 = vsub.f32 %v6267_v34, %v6268_v36  ;;  %v6758_v39 = vsub.f32 %v6756_v35, %v6757_v37  ;;  %10149 = vmatprep.mubr.f32.mxu1 %v11214_v1 }
 0x300   : > { %v6270_v43 = vand.u32 4294901760, %v6269_v38  ;;  %v6759_v44 = vand.u32 4294901760, %v6758_v39 }
 0x302   : > { %10117 = vmatprep.subr.mxu0 %v6270_v43  ;;  %10147 = vmatprep.subr.mxu1 %v6759_v44 }
 0x303   : > { %10118 = vmatpush3.msra.mxu0 %v6270_v43  ;;  %10148 = vmatpush3.msra.mxu1 %v6759_v44 }
 0x304   : > { %10120 = vmatmul.mubr.f32.vlgmr.msra.gmra.mrb[12].mxu0 %v11250_v55  ;;  %10122 = vmatprep.subr.mxu0 %v6267_v34 }
 0x305   : > { %10150 = vmatmul.mubr.f32.vlgmr.msra.gmra.mrb[12].mxu1 %v11250_v55  ;;  %10152 = vmatprep.subr.mxu1 %v6756_v35 }
 0x306   : > { %10123 = vmatpush3.msra.mxu0 %v6267_v34  ;;  %10153 = vmatpush3.msra.mxu1 %v6756_v35 }
 0x307   : > { %10127 = vmatprep.subr.mxu0 %v6180_v32  ;;  %10157 = vmatprep.subr.mxu1 %v6669_v33 }
 0x308   : > { %10124 = vmatprep.mubr.f32.mxu0 %v11217_v7  ;;  %10154 = vmatprep.mubr.f32.mxu1 %v11217_v7 }
 0x30c   : > { %10125 = vmatmul.mubr.f32.vlgmr.msra.gmra.mrb[12].mxu0 %v11253_v0 }
 0x30d   : > { %10128 = vmatpush3.msra.mxu0 %v6180_v32  ;;  %10155 = vmatmul.mubr.f32.vlgmr.msra.gmra.mrb[12].mxu1 %v11253_v0 }
 0x30e   : > { %10158 = vmatpush3.msra.mxu1 %v6669_v33  ;;  %10132 = vmatprep.subr.mxu0 %v6268_v36 }
 0x30f   : > { %10162 = vmatprep.subr.mxu1 %v6757_v37  ;;  %10129 = vmatprep.mubr.f32.mxu0 %v11228_v8 }
 0x310   : > { %10159 = vmatprep.mubr.f32.mxu1 %v11228_v8 }
 0x314   : > { %10130 = vmatmul.mubr.f32.vlgmr.msra.gmra.mrb[12].mxu0 %v11256_v12 }
 0x315   : > { %10133 = vmatpush3.msra.mxu0 %v6268_v36  ;;  %10160 = vmatmul.mubr.f32.vlgmr.msra.gmra.mrb[12].mxu1 %v11256_v12 }
 0x316   : > { %10163 = vmatpush3.msra.mxu1 %v6757_v37  ;;  %10137 = vmatprep.subr.mxu0 %v6180_v32 }
 0x317   : > { %10167 = vmatprep.subr.mxu1 %v6669_v33  ;;  %10134 = vmatprep.mubr.f32.mxu0 %v11214_v1 }
 0x318   : > { %10164 = vmatprep.mubr.f32.mxu1 %v11214_v1 }
 0x31c   : > { %10135 = vmatmul.mubr.f32.vlgmr.msra.gmra.mrb[12].mxu0 %v11250_v55 }
 0x31d   : > { %10138 = vmatpush3.msra.mxu0 %v6180_v32  ;;  %10165 = vmatmul.mubr.f32.vlgmr.msra.gmra.mrb[12].mxu1 %v11250_v55 }
 0x31e   : > { %10168 = vmatpush3.msra.mxu1 %v6669_v33  ;;  %10139 = vmatprep.mubr.f32.mxu0 %v11214_v1 }
 0x31f   : > { %10169 = vmatprep.mubr.f32.mxu1 %v11214_v1 }
 0x323   : > { %v3842_v45 = vpop.f32.mrb[6].mxu0  ;;  %v4291_v4 = vpop.f32.mrb[6].mxu1 }
 0x324   : > { %v7158_v46 = vand.u32 4294901760, %v3842_v45  ;;  %v7647_v5 = vand.u32 4294901760, %v4291_v4  ;;  %v9961_v47 = vpop.f32.mrb[7].mxu0  ;;  %v9991_v48 = vpop.f32.mrb[7].mxu1  ;;  %10140 = vmatmul.mubr.f32.vlgmr.msra.gmra.mrb[12].mxu0 %v11250_v55 }
 0x325   : > { %10170 = vmatmul.mubr.f32.vlgmr.msra.gmra.mrb[12].mxu1 %v11250_v55  ;;  %10174 = vmatprep.mubr.f32.mxu0 %v11240_v9 }
 0x326   : > { %v7245_v49 = vsub.f32 %v3842_v45, %v7158_v46  ;;  %v7734_v50 = vsub.f32 %v4291_v4, %v7647_v5  ;;  %10172 = vmatprep.subr.mxu0 %v7158_v46  ;;  %10202 = vmatprep.subr.mxu1 %v7647_v5 }
 0x327   : > { %10173 = vmatpush3.msra.mxu0 %v7158_v46  ;;  %10203 = vmatpush3.msra.mxu1 %v7647_v5 }
 0x328   : > { %10204 = vmatprep.mubr.f32.mxu1 %v11240_v9  ;;  %10175 = vmatmul.mubr.f32.vlgmr.msra.gmra.mrb[14].mxu0 %v11260_v18  ;;  %v7246_v51 = vand.u32 4294901760, %v7245_v49  ;;  %v7735_v41 = vand.u32 4294901760, %v7734_v50 }
 0x329   : > { %10205 = vmatmul.mubr.f32.vlgmr.msra.gmra.mrb[14].mxu1 %v11260_v18  ;;  %10179 = vmatprep.mubr.f32.mxu0 %v11214_v1 }
 0x32a   : > { %v7247_v42 = vsub.f32 %v7245_v49, %v7246_v51  ;;  %v7736_v52 = vsub.f32 %v7734_v50, %v7735_v41  ;;  %10209 = vmatprep.mubr.f32.mxu1 %v11214_v1 }
 0x32c   : > { %v7248_v53 = vand.u32 4294901760, %v7247_v42  ;;  %v7737_v58 = vand.u32 4294901760, %v7736_v52 }
 0x32e   : > { %10177 = vmatprep.subr.mxu0 %v7248_v53  ;;  %10207 = vmatprep.subr.mxu1 %v7737_v58 }
 0x32f   : > { %10178 = vmatpush3.msra.mxu0 %v7248_v53  ;;  %10208 = vmatpush3.msra.mxu1 %v7737_v58 }
 0x330   : > { %10180 = vmatmul.mubr.f32.vlgmr.msra.gmra.mrb[14].mxu0 %v11250_v55  ;;  %10182 = vmatprep.subr.mxu0 %v7245_v49 }
 0x331   : > { %10210 = vmatmul.mubr.f32.vlgmr.msra.gmra.mrb[14].mxu1 %v11250_v55  ;;  %10212 = vmatprep.subr.mxu1 %v7734_v50 }
 0x332   : > { %10183 = vmatpush3.msra.mxu0 %v7245_v49  ;;  %10213 = vmatpush3.msra.mxu1 %v7734_v50 }
 0x333   : > { %10187 = vmatprep.subr.mxu0 %v7158_v46  ;;  %10217 = vmatprep.subr.mxu1 %v7647_v5 }
 0x334   : > { %10184 = vmatprep.mubr.f32.mxu0 %v11217_v7  ;;  %10214 = vmatprep.mubr.f32.mxu1 %v11217_v7 }
 0x338   : > { %10185 = vmatmul.mubr.f32.vlgmr.msra.gmra.mrb[14].mxu0 %v11253_v0 }
 0x339   : > { %10188 = vmatpush3.msra.mxu0 %v7158_v46  ;;  %10215 = vmatmul.mubr.f32.vlgmr.msra.gmra.mrb[14].mxu1 %v11253_v0 }
 0x33a   : > { %10218 = vmatpush3.msra.mxu1 %v7647_v5  ;;  %10192 = vmatprep.subr.mxu0 %v7246_v51 }
 0x33b   : > { %10222 = vmatprep.subr.mxu1 %v7735_v41  ;;  %10189 = vmatprep.mubr.f32.mxu0 %v11228_v8 }
 0x33c   : > { %10219 = vmatprep.mubr.f32.mxu1 %v11228_v8 }
 0x340   : > { %10190 = vmatmul.mubr.f32.vlgmr.msra.gmra.mrb[14].mxu0 %v11256_v12 }
 0x341   : > { %10193 = vmatpush3.msra.mxu0 %v7246_v51  ;;  %10220 = vmatmul.mubr.f32.vlgmr.msra.gmra.mrb[14].mxu1 %v11256_v12 }
 0x342   : > { %10223 = vmatpush3.msra.mxu1 %v7735_v41  ;;  %10197 = vmatprep.subr.mxu0 %v7158_v46 }
 0x343   : > { %10227 = vmatprep.subr.mxu1 %v7647_v5  ;;  %10194 = vmatprep.mubr.f32.mxu0 %v11214_v1 }
 0x344   : > { %10224 = vmatprep.mubr.f32.mxu1 %v11214_v1 }
 0x348   : > { %10195 = vmatmul.mubr.f32.vlgmr.msra.gmra.mrb[14].mxu0 %v11250_v55 }
 0x349   : > { %10198 = vmatpush3.msra.mxu0 %v7158_v46  ;;  %10225 = vmatmul.mubr.f32.vlgmr.msra.gmra.mrb[14].mxu1 %v11250_v55 }
 0x34a   : > { %10228 = vmatpush3.msra.mxu1 %v7647_v5  ;;  %10199 = vmatprep.mubr.f32.mxu0 %v11214_v1 }
 0x34b   : > { %10229 = vmatprep.mubr.f32.mxu1 %v11214_v1 }
 0x34f   : > { %v4740_v59 = vpop.f32.mrb[8].mxu0  ;;  %v5189_v60 = vpop.f32.mrb[8].mxu1 }
 0x350   : > { %v8136_v61 = vand.u32 4294901760, %v4740_v59  ;;  %v8625_v62 = vand.u32 4294901760, %v5189_v60  ;;  %v10021_v2 = vpop.f32.mrb[9].mxu0  ;;  %v10051_v3 = vpop.f32.mrb[9].mxu1  ;;  %10200 = vmatmul.mubr.f32.vlgmr.msra.gmra.mrb[14].mxu0 %v11250_v55 }
 0x351   : > { %10230 = vmatmul.mubr.f32.vlgmr.msra.gmra.mrb[14].mxu1 %v11250_v55  ;;  %10234 = vmatprep.mubr.f32.mxu0 %v11240_v9 }
 0x352   : > { %v8223_v63 = vsub.f32 %v4740_v59, %v8136_v61  ;;  %v8712_v6 = vsub.f32 %v5189_v60, %v8625_v62  ;;  %10232 = vmatprep.subr.mxu0 %v8136_v61  ;;  %10262 = vmatprep.subr.mxu1 %v8625_v62 }
 0x353   : > { %10233 = vmatpush3.msra.mxu0 %v8136_v61  ;;  %10263 = vmatpush3.msra.mxu1 %v8625_v62 }
 0x354   : > { %10264 = vmatprep.mubr.f32.mxu1 %v11240_v9  ;;  %10235 = vmatmul.mubr.f32.vlgmr.msra.gmra.mrb[16].mxu0 %v11260_v18  ;;  %v8224_v54 = vand.u32 4294901760, %v8223_v63  ;;  %v8713_v30 = vand.u32 4294901760, %v8712_v6 }
 0x355   : > { %10265 = vmatmul.mubr.f32.vlgmr.msra.gmra.mrb[16].mxu1 %v11260_v18  ;;  %10239 = vmatprep.mubr.f32.mxu0 %v11214_v1 }
 0x356   : > { %v8225_v40 = vsub.f32 %v8223_v63, %v8224_v54  ;;  %v8714_v10 = vsub.f32 %v8712_v6, %v8713_v30  ;;  %10269 = vmatprep.mubr.f32.mxu1 %v11214_v1 }
 0x358   : > { %v8226_v11 = vand.u32 4294901760, %v8225_v40  ;;  %v8715_v13 = vand.u32 4294901760, %v8714_v10 }
 0x35a   : > { %10237 = vmatprep.subr.mxu0 %v8226_v11  ;;  %10267 = vmatprep.subr.mxu1 %v8715_v13 }
 0x35b   : > { %10238 = vmatpush3.msra.mxu0 %v8226_v11  ;;  %10268 = vmatpush3.msra.mxu1 %v8715_v13 }
 0x35c   : > { %10240 = vmatmul.mubr.f32.vlgmr.msra.gmra.mrb[16].mxu0 %v11250_v55  ;;  %10242 = vmatprep.subr.mxu0 %v8223_v63 }
 0x35d   : > { %10270 = vmatmul.mubr.f32.vlgmr.msra.gmra.mrb[16].mxu1 %v11250_v55  ;;  %10272 = vmatprep.subr.mxu1 %v8712_v6 }
 0x35e   : > { %10243 = vmatpush3.msra.mxu0 %v8223_v63  ;;  %10273 = vmatpush3.msra.mxu1 %v8712_v6 }
 0x35f   : > { %10247 = vmatprep.subr.mxu0 %v8136_v61  ;;  %10277 = vmatprep.subr.mxu1 %v8625_v62 }
 0x360   : > { %10244 = vmatprep.mubr.f32.mxu0 %v11217_v7  ;;  %10274 = vmatprep.mubr.f32.mxu1 %v11217_v7 }
 0x364   : > { %10245 = vmatmul.mubr.f32.vlgmr.msra.gmra.mrb[16].mxu0 %v11253_v0 }
 0x365   : > { %10248 = vmatpush3.msra.mxu0 %v8136_v61  ;;  %10275 = vmatmul.mubr.f32.vlgmr.msra.gmra.mrb[16].mxu1 %v11253_v0 }
 0x366   : > { %10278 = vmatpush3.msra.mxu1 %v8625_v62  ;;  %10252 = vmatprep.subr.mxu0 %v8224_v54 }
 0x367   : > { %10282 = vmatprep.subr.mxu1 %v8713_v30  ;;  %10249 = vmatprep.mubr.f32.mxu0 %v11228_v8 }
 0x368   : > { %10279 = vmatprep.mubr.f32.mxu1 %v11228_v8 }
 0x36c   : > { %10250 = vmatmul.mubr.f32.vlgmr.msra.gmra.mrb[16].mxu0 %v11256_v12 }
 0x36d   : > { %10253 = vmatpush3.msra.mxu0 %v8224_v54  ;;  %10280 = vmatmul.mubr.f32.vlgmr.msra.gmra.mrb[16].mxu1 %v11256_v12 }
 0x36e   : > { %10283 = vmatpush3.msra.mxu1 %v8713_v30  ;;  %10257 = vmatprep.subr.mxu0 %v8136_v61 }
 0x36f   : > { %10287 = vmatprep.subr.mxu1 %v8625_v62  ;;  %10254 = vmatprep.mubr.f32.mxu0 %v11214_v1 }
 0x370   : > { %10284 = vmatprep.mubr.f32.mxu1 %v11214_v1 }
 0x374   : > { %10255 = vmatmul.mubr.f32.vlgmr.msra.gmra.mrb[16].mxu0 %v11250_v55 }
 0x375   : > { %10258 = vmatpush3.msra.mxu0 %v8136_v61  ;;  %10285 = vmatmul.mubr.f32.vlgmr.msra.gmra.mrb[16].mxu1 %v11250_v55 }
 0x376   : > { %10288 = vmatpush3.msra.mxu1 %v8625_v62  ;;  %10259 = vmatprep.mubr.f32.mxu0 %v11214_v1 }
 0x377   : > { %10289 = vmatprep.mubr.f32.mxu1 %v11214_v1 }
 0x37c   : > { %10260 = vmatmul.mubr.f32.vlgmr.msra.gmra.mrb[16].mxu0 %v11250_v55 }
 0x37d   : > { %10290 = vmatmul.mubr.f32.vlgmr.msra.gmra.mrb[16].mxu1 %v11250_v55 }
 0x3cb   : > { %v10081_v7 = vpop.f32.mrb[10].mxu0 }
 0x3cc   : > { %v10111_v8 = vpop.f32.mrb[10].mxu1  ;;  %v5680_v9 = vpop.f32.mrb[11].mxu0  ;;  %v9285_v0 = vrot.slane %v10081_v7, 1  ;;  %v9302_v12 = vrot.slane %v10081_v7, 2  ;;  %v9319_v14 = vrot.slane %v10081_v7, 3  ;;  %v9336_v1 = vrot.slane %v10081_v7, 4 }
 0x3cd   : > { %v6169_v15 = vpop.f32.mrb[11].mxu1  ;;  %v9143_v16 = vrot.slane %v5680_v9, 1  ;;  %v9303_v56 = vrot.slane %v10111_v8, 1  ;;  %v9160_v17 = vrot.slane %v5680_v9, 2  ;;  %v9320_v19 = vrot.slane %v10111_v8, 2 }
 0x3ce   : > { %v9286_v57 = vsel %vm9122_vm10, %v10111_v8, %v9285_v0  ;;  %v9161_v18 = vrot.slane %v6169_v15, 1  ;;  %v9177_v21 = vrot.slane %v5680_v9, 3  ;;  %v9178_v22 = vrot.slane %v6169_v15, 2 }
 0x3cf   : > { %v9144_v20 = vsel %vm9122_vm10, %v6169_v15, %v9143_v16  ;;  %v9304_v55 = vsel %vm9122_vm10, %v9303_v56, %v9302_v12  ;;  %v9321_v24 = vsel %vm9122_vm10, %v9320_v19, %v9319_v14  ;;  %v9337_v25 = vrot.slane %v10111_v8, 3 }
 0x3d0   : > { %v9162_v23 = vsel %vm9122_vm10, %v9161_v18, %v9160_v17  ;;  %v9194_v26 = vrot.slane %v5680_v9, 4  ;;  %v9270_v27 = vrot.slane %v10111_v8, 7  ;;  %v9121_v31 = vrot.slane %v6169_v15, 7 }
 0x3d1   : > { %v9179_v32 = vsel %vm9122_vm10, %v9178_v22, %v9177_v21  ;;  %v9195_v33 = vrot.slane %v6169_v15, 3  ;;  %v9338_v28 = vsel %vm9122_vm10, %v9337_v25, %v9336_v1  ;;  %v9353_v29 = vrot.slane %v10081_v7, 5 }
 0x3d2   : > { %v9354_v34 = vrot.slane %v10111_v8, 4  ;;  %v9211_v35 = vrot.slane %v5680_v9, 5  ;;  %v9212_v37 = vrot.slane %v6169_v15, 4  ;;  %v9370_v38 = vrot.slane %v10081_v7, 6 }
 0x3d3   : > { %v9196_v36 = vsel %vm9122_vm10, %v9195_v33, %v9194_v26  ;;  %v9371_v39 = vrot.slane %v10111_v8, 5  ;;  %v9228_v44 = vrot.slane %v5680_v9, 6  ;;  %v9229_v45 = vrot.slane %v6169_v15, 5 }
 0x3d4   : > { %v9355_v43 = vsel %vm9122_vm10, %v9354_v34, %v9353_v29  ;;  %v9387_v4 = vrot.slane %v10081_v7, 7  ;;  %v9213_v46 = vsel %vm9122_vm10, %v9212_v37, %v9211_v35  ;;  %v9388_v47 = vrot.slane %v10111_v8, 6 }
 0x3d5   : > { %v9372_v5 = vsel %vm9122_vm10, %v9371_v39, %v9370_v38  ;;  %v9245_v48 = vrot.slane %v5680_v9, 7  ;;  %v9230_v49 = vsel %vm9122_vm10, %v9229_v45, %v9228_v44  ;;  %v9246_v50 = vrot.slane %v6169_v15, 6 }
 0x3d6   : > { %v11369_v51 = vsel %vm9122_vm10, %v9270_v27, %v10081_v7  ;;  %v11372_v41 = vsel %vm9122_vm10, %v9121_v31, %v5680_v9  ;;  %v9389_v42 = vsel %vm9122_vm10, %v9388_v47, %v9387_v4 }
 0x3d7   : > { %v9247_v52 = vsel %vm9122_vm10, %v9246_v50, %v9245_v48 }
 0x3f7   : > { %v10141_v53 = vpop.f32.mrb[12].mxu0 }
 0x3f8   : > { %v10171_v58 = vpop.f32.mrb[12].mxu1  ;;  %v6658_v59 = vpop.f32.mrb[13].mxu0  ;;  %v9287_v60 = vrot.slane %v10141_v53, 7  ;;  %v9305_v61 = vsel %vm9125_vm11, %v10141_v53, %v9304_v55  ;;  %v9322_v62 = vrot.slane %v10141_v53, 1  ;;  %v9339_v2 = vrot.slane %v10141_v53, 2 }
 0x3f9   : > { %v7147_v3 = vpop.f32.mrb[13].mxu1  ;;  %v9289_v63 = vrot.slane %v10171_v58, 6  ;;  %v9145_v6 = vrot.slane %v6658_v59, 7  ;;  %v9306_v54 = vrot.slane %v10171_v58, 7  ;;  %v9163_v30 = vsel %vm9125_vm11, %v6658_v59, %v9162_v23 }
 0x3fa   : > { %v9288_v40 = vsel %vm9125_vm11, %v9287_v60, %v9286_v57  ;;  %v9147_v10 = vrot.slane %v7147_v3, 6  ;;  %v9164_v11 = vrot.slane %v7147_v3, 7  ;;  %v9323_v13 = vsel %vm9125_vm11, %v9322_v62, %v9321_v24 }
 0x3fb   : > { %v11381_v7 = vsel %vm9128_vm12, %v9289_v63, %v9288_v40  ;;  %v9146_v8 = vsel %vm9125_vm11, %v9145_v6, %v9144_v20  ;;  %v11385_v9 = vsel %vm9128_vm12, %v9306_v54, %v9305_v61  ;;  %v11388_v0 = vsel %vm9128_vm12, %v10171_v58, %v9323_v13 }
 0x3fc   : > { %v11391_v12 = vsel %vm9128_vm12, %v9147_v10, %v9146_v8  ;;  %v11394_v14 = vsel %vm9128_vm12, %v9164_v11, %v9163_v30  ;;  %v9180_v15 = vrot.slane %v6658_v59, 1  ;;  %v9340_v16 = vsel %vm9125_vm11, %v9339_v2, %v9338_v28 }
 0x3fd   : > { %v9341_v56 = vrot.slane %v10171_v58, 1  ;;  %v9197_v17 = vrot.slane %v6658_v59, 2  ;;  %v9199_v57 = vrot.slane %v7147_v3, 1  ;;  %v9356_v18 = vrot.slane %v10141_v53, 3 }
 0x3fe   : > { %v9181_v19 = vsel %vm9125_vm11, %v9180_v15, %v9179_v32  ;;  %v9358_v1 = vrot.slane %v10171_v58, 2  ;;  %v9214_v20 = vrot.slane %v6658_v59, 3  ;;  %v9216_v55 = vrot.slane %v7147_v3, 2 }
 0x3ff   : > { %v11399_v21 = vsel %vm9128_vm12, %v7147_v3, %v9181_v19  ;;  %v9342_v22 = vsel %vm9128_vm12, %v9341_v56, %v9340_v16  ;;  %v9198_v23 = vsel %vm9125_vm11, %v9197_v17, %v9196_v36  ;;  %v9357_v24 = vsel %vm9125_vm11, %v9356_v18, %v9355_v43 }
 0x400   : > { %v9200_v25 = vsel %vm9128_vm12, %v9199_v57, %v9198_v23  ;;  %v11406_v26 = vsel %vm9128_vm12, %v9358_v1, %v9357_v24  ;;  %v9215_v27 = vsel %vm9125_vm11, %v9214_v20, %v9213_v46  ;;  %v9373_v31 = vrot.slane %v10141_v53, 4 }
 0x401   : > { %v11410_v32 = vsel %vm9128_vm12, %v9216_v55, %v9215_v27  ;;  %v9375_v33 = vrot.slane %v10171_v58, 3  ;;  %v9231_v28 = vrot.slane %v6658_v59, 4  ;;  %v9233_v29 = vrot.slane %v7147_v3, 3 }
 0x402   : > { %v9374_v34 = vsel %vm9125_vm11, %v9373_v31, %v9372_v5  ;;  %v9390_v35 = vrot.slane %v10141_v53, 5  ;;  %v9392_v36 = vrot.slane %v10171_v58, 4  ;;  %v9248_v37 = vrot.slane %v6658_v59, 5 }
 0x403   : > { %v9376_v38 = vsel %vm9128_vm12, %v9375_v33, %v9374_v34  ;;  %v9232_v39 = vsel %vm9125_vm11, %v9231_v28, %v9230_v49  ;;  %v9250_v43 = vrot.slane %v7147_v3, 4  ;;  %v9272_v44 = vrot.slane %v10141_v53, 6 }
 0x404   : > { %v11416_v45 = vsel %vm9128_vm12, %v9233_v29, %v9232_v39  ;;  %v9391_v4 = vsel %vm9125_vm11, %v9390_v35, %v9389_v42  ;;  %v9249_v46 = vsel %vm9125_vm11, %v9248_v37, %v9247_v52  ;;  %v9274_v47 = vrot.slane %v10171_v58, 5 }
 0x405   : > { %v11421_v48 = vsel %vm9128_vm12, %v9392_v36, %v9391_v4  ;;  %v11424_v5 = vsel %vm9128_vm12, %v9250_v43, %v9249_v46  ;;  %v9273_v50 = vsel %vm9125_vm11, %v9272_v44, %v11369_v51  ;;  %v9124_v49 = vrot.slane %v6658_v59, 6 }
 0x406   : > { %v11429_v53 = vsel %vm9128_vm12, %v9274_v47, %v9273_v50  ;;  %v9127_v60 = vrot.slane %v7147_v3, 5 }
 0x407   : > { %v9126_v42 = vsel %vm9125_vm11, %v9124_v49, %v11372_v41 }
 0x408   : > { %v11434_v52 = vsel %vm9128_vm12, %v9127_v60, %v9126_v42 }
 0x423   : > { %v10201_v58 = vpop.f32.mrb[14].mxu0 }
 0x424   : > { %v10231_v61 = vpop.f32.mrb[14].mxu1  ;;  %v7636_v62 = vpop.f32.mrb[15].mxu0  ;;  %v9291_v2 = vrot.slane %v10201_v58, 5  ;;  %v9308_v63 = vrot.slane %v10201_v58, 6  ;;  %v9325_v6 = vrot.slane %v10201_v58, 7  ;;  %v9343_v51 = vsel %vm9131_vm13, %v10201_v58, %v9342_v22 }
 0x425   : > { %v8125_v59 = vpop.f32.mrb[15].mxu1  ;;  %v9293_v54 = vrot.slane %v10231_v61, 4  ;;  %v9149_v30 = vrot.slane %v7636_v62, 5  ;;  %v9310_v3 = vrot.slane %v10231_v61, 5  ;;  %v9166_v40 = vrot.slane %v7636_v62, 6 }
 0x426   : > { %v9292_v41 = vsel %vm9131_vm13, %v9291_v2, %v11381_v7  ;;  %v9151_v10 = vrot.slane %v8125_v59, 4  ;;  %v9309_v11 = vsel %vm9131_vm13, %v9308_v63, %v11385_v9  ;;  %v9168_v13 = vrot.slane %v8125_v59, 5 }
 0x427   : > { %v11442_v8 = vsel %vm9134_vm14, %v9293_v54, %v9292_v41  ;;  %v9150_v15 = vsel %vm9131_vm13, %v9149_v30, %v11391_v12  ;;  %v11447_v16 = vsel %vm9134_vm14, %v9310_v3, %v9309_v11  ;;  %v9167_v56 = vsel %vm9131_vm13, %v9166_v40, %v11394_v14 }
 0x428   : > { %v11452_v17 = vsel %vm9134_vm14, %v9151_v10, %v9150_v15  ;;  %v11455_v7 = vsel %vm9134_vm14, %v9168_v13, %v9167_v56  ;;  %v9326_v9 = vsel %vm9131_vm13, %v9325_v6, %v11388_v0  ;;  %v9327_v57 = vrot.slane %v10231_v61, 6 }
 0x429   : > { %v9183_v18 = vrot.slane %v7636_v62, 7  ;;  %v9185_v19 = vrot.slane %v8125_v59, 6  ;;  %v9344_v1 = vrot.slane %v10231_v61, 7  ;;  %v9201_v12 = vsel %vm9131_vm13, %v7636_v62, %v9200_v25 }
 0x42a   : > { %v11461_v20 = vsel %vm9134_vm14, %v9327_v57, %v9326_v9  ;;  %v9202_v55 = vrot.slane %v8125_v59, 7  ;;  %v9360_v14 = vrot.slane %v10201_v58, 1  ;;  %v9218_v22 = vrot.slane %v7636_v62, 1 }
 0x42b   : > { %v9184_v23 = vsel %vm9131_vm13, %v9183_v18, %v11399_v21  ;;  %v11466_v24 = vsel %vm9134_vm14, %v9344_v1, %v9343_v51  ;;  %v9377_v27 = vrot.slane %v10201_v58, 2  ;;  %v9379_v0 = vrot.slane %v10231_v61, 1 }
 0x42c   : > { %v11469_v31 = vsel %vm9134_vm14, %v9185_v19, %v9184_v23  ;;  %v11472_v33 = vsel %vm9134_vm14, %v9202_v55, %v9201_v12  ;;  %v9361_v25 = vsel %vm9131_vm13, %v9360_v14, %v11406_v26  ;;  %v9219_v28 = vsel %vm9131_vm13, %v9218_v22, %v11410_v32 }
 0x42d   : > { %v11479_v29 = vsel %vm9134_vm14, %v10231_v61, %v9361_v25  ;;  %v11482_v21 = vsel %vm9134_vm14, %v8125_v59, %v9219_v28  ;;  %v9378_v34 = vsel %vm9131_vm13, %v9377_v27, %v9376_v38  ;;  %v9235_v35 = vrot.slane %v7636_v62, 2 }
 0x42e   : > { %v11486_v36 = vsel %vm9134_vm14, %v9379_v0, %v9378_v34  ;;  %v9237_v37 = vrot.slane %v8125_v59, 1  ;;  %v9394_v39 = vrot.slane %v10201_v58, 3  ;;  %v9396_v43 = vrot.slane %v10231_v61, 2 }
 0x42f   : > { %v9236_v26 = vsel %vm9131_vm13, %v9235_v35, %v11416_v45  ;;  %v9252_v44 = vrot.slane %v7636_v62, 3  ;;  %v9254_v32 = vrot.slane %v8125_v59, 2  ;;  %v9276_v4 = vrot.slane %v10201_v58, 4 }
 0x430   : > { %v11491_v46 = vsel %vm9134_vm14, %v9237_v37, %v9236_v26  ;;  %v9395_v47 = vsel %vm9131_vm13, %v9394_v39, %v11421_v48  ;;  %v9278_v38 = vrot.slane %v10231_v61, 3  ;;  %v9130_v50 = vrot.slane %v7636_v62, 4 }
 0x431   : > { %v11496_v49 = vsel %vm9134_vm14, %v9396_v43, %v9395_v47  ;;  %v9253_v60 = vsel %vm9131_vm13, %v9252_v44, %v11424_v5  ;;  %v9277_v45 = vsel %vm9131_vm13, %v9276_v4, %v11429_v53  ;;  %v9133_v42 = vrot.slane %v8125_v59, 3 }
 0x432   : > { %v11503_v58 = vsel %vm9134_vm14, %v9254_v32, %v9253_v60  ;;  %v11506_v2 = vsel %vm9134_vm14, %v9278_v38, %v9277_v45  ;;  %v9132_v48 = vsel %vm9131_vm13, %v9130_v50, %v11434_v52 }
 0x433   : > { %v11511_v61 = vsel %vm9134_vm14, %v9133_v42, %v9132_v48 }
 0x44f   : > { %v11513_v62 = vpop.f32.mrb[16].mxu0 }
 0x450   : > { %v11515_v5 = vpop.f32.mrb[16].mxu1  ;;  %v11517_v53 = vpop.f32.mrb[17].mxu0  ;;  %v9295_v63 = vrot.slane %v11513_v62, 3  ;;  %v9312_v6 = vrot.slane %v11513_v62, 4  ;;  %v9329_v51 = vrot.slane %v11513_v62, 5  ;;  %v9346_v59 = vrot.slane %v11513_v62, 6 }
 0x451   : > { %v11523_v52 = vpop.f32.mrb[17].mxu1  ;;  %v9297_v54 = vrot.slane %v11515_v5, 2  ;;  %v9153_v30 = vrot.slane %v11517_v53, 3  ;;  %v9314_v3 = vrot.slane %v11515_v5, 3  ;;  %v9170_v40 = vrot.slane %v11517_v53, 4 }
 0x452   : > { %v9296_v41 = vsel %vm9137_vm15, %v9295_v63, %v11442_v8  ;;  %v9155_v10 = vrot.slane %v11523_v52, 2  ;;  %v9313_v11 = vsel %vm9137_vm15, %v9312_v6, %v11447_v16  ;;  %v9172_v13 = vrot.slane %v11523_v52, 3 }
 0x453   : > { %v9298_v15 = vsel %vm9140_vm0, %v9297_v54, %v9296_v41  ;;  %v9154_v56 = vsel %vm9137_vm15, %v9153_v30, %v11452_v17  ;;  %v9315_v9 = vsel %vm9140_vm0, %v9314_v3, %v9313_v11  ;;  %v9171_v57 = vsel %vm9137_vm15, %v9170_v40, %v11455_v7 }
 0x454   : > { %9299 = vrot.lane.b32.xlu1 %v9298_v15, %s10564_s10  ;;  %v9156_v8 = vsel %vm9140_vm0, %v9155_v10, %v9154_v56  ;;  %v9173_v18 = vsel %vm9140_vm0, %v9172_v13, %v9171_v57  ;;  %v9330_v16 = vsel %vm9137_vm15, %v9329_v51, %v11461_v20  ;;  %v9331_v19 = vrot.slane %v11515_v5, 4 }
 0x455   : > { %9157 = vrot.lane.b32.xlu0 %v9156_v8, %s10564_s10  ;;  %v9187_v1 = vrot.slane %v11517_v53, 5  ;;  %v9189_v17 = vrot.slane %v11523_v52, 4  ;;  %v9347_v12 = vsel %vm9137_vm15, %v9346_v59, %v11466_v24  ;;  %v9348_v7 = vrot.slane %v11515_v5, 5 }
 0x456   : > { %v9332_v55 = vsel %vm9140_vm0, %v9331_v19, %v9330_v16  ;;  %v9204_v14 = vrot.slane %v11517_v53, 6  ;;  %v9206_v22 = vrot.slane %v11523_v52, 5  ;;  %v9363_v20 = vrot.slane %v11513_v62, 7 }
 0x457   : > { %v9188_v23 = vsel %vm9137_vm15, %v9187_v1, %v11469_v31  ;;  %v9349_v27 = vsel %vm9140_vm0, %v9348_v7, %v9347_v12  ;;  %v9365_v0 = vrot.slane %v11515_v5, 6  ;;  %v9221_v25 = vrot.slane %v11517_v53, 7 }
 0x458   : > { %9316 = vrot.lane.b32.xlu1 %v9315_v9, %s10565_s11  ;;  %v9190_v24 = vsel %vm9140_vm0, %v9189_v17, %v9188_v23  ;;  %v9205_v28 = vsel %vm9137_vm15, %v9204_v14, %v11472_v33  ;;  %v9364_v34 = vsel %vm9137_vm15, %v9363_v20, %v11479_v29  ;;  %v9223_v35 = vrot.slane %v11523_v52, 6 }
 0x459   : > { %9174 = vrot.lane.b32.xlu0 %v9173_v18, %s10565_s11  ;;  %v9207_v31 = vsel %vm9140_vm0, %v9206_v22, %v9205_v28  ;;  %v9366_v37 = vsel %vm9140_vm0, %v9365_v0, %v9364_v34  ;;  %v9222_v39 = vsel %vm9137_vm15, %v9221_v25, %v11482_v21  ;;  %v9381_v43 = vsel %vm9137_vm15, %v11513_v62, %v11486_v36 }
 0x45a   : > { %v9224_v26 = vsel %vm9140_vm0, %v9223_v35, %v9222_v39  ;;  %v9382_v33 = vrot.slane %v11515_v5, 7  ;;  %v9239_v29 = vsel %vm9137_vm15, %v11517_v53, %v11491_v46  ;;  %v9240_v44 = vrot.slane %v11523_v52, 7 }
 0x45b   : > { %v9398_v32 = vrot.slane %v11513_v62, 1  ;;  %v9256_v4 = vrot.slane %v11517_v53, 1  ;;  %v9282_v21 = vrot.slane %v11515_v5, 1  ;;  %v9280_v47 = vrot.slane %v11513_v62, 2 }
 0x45c   : > { %9333 = vrot.lane.b32.xlu1 %v9332_v55, %s10566_s13  ;;  %v9383_v36 = vsel %vm9140_vm0, %v9382_v33, %v9381_v43  ;;  %v9241_v38 = vsel %vm9140_vm0, %v9240_v44, %v9239_v29  ;;  %v9139_v50 = vrot.slane %v11523_v52, 1  ;;  %v9136_v46 = vrot.slane %v11517_v53, 2 }
 0x45d   : > { %9191 = vrot.lane.b32.xlu0 %v9190_v24, %s10566_s13  ;;  %v9399_v60 = vsel %vm9137_vm15, %v9398_v32, %v11496_v49  ;;  %v9257_v45 = vsel %vm9137_vm15, %v9256_v4, %v11503_v58  ;;  %v9281_v42 = vsel %vm9137_vm15, %v9280_v47, %v11506_v2 }
 0x45e   : > { %v9400_v48 = vsel %vm9140_vm0, %v11515_v5, %v9399_v60  ;;  %v9258_v62 = vsel %vm9140_vm0, %v11523_v52, %v9257_v45  ;;  %v9283_v63 = vsel %vm9140_vm0, %v9282_v21, %v9281_v42  ;;  %v9138_v53 = vsel %vm9137_vm15, %v9136_v46, %v11511_v61 }
 0x45f   : > { %v9141_v6 = vsel %vm9140_vm0, %v9139_v50, %v9138_v53 }
 0x460   : > { %9350 = vrot.lane.b32.xlu1 %v9349_v27, %s10567_s14 }
 0x461   : > { %9208 = vrot.lane.b32.xlu0 %v9207_v31, %s10567_s14 }
 0x464   : > { %9367 = vrot.lane.b32.xlu1 %v9366_v37, %s10562_s19 }
 0x465   : > { %9225 = vrot.lane.b32.xlu0 %v9224_v26, %s10562_s19 }
 0x468   : > { %9384 = vrot.lane.b32.xlu1 %v9383_v36, %s10560_s15 }
 0x469   : > { %9242 = vrot.lane.b32.xlu0 %v9241_v38, %s10560_s15 }
 0x46c   : > { %9401 = vrot.lane.b32.xlu1 %v9400_v48, %s10557_s12 }
 0x46d   : > { %9259 = vrot.lane.b32.xlu0 %v9258_v62, %s10557_s12 }
 0x4c6   : > { %v9300_v49 = vpop.permute.xlu1 %9299 }
 0x4c7   : > { %v9158_v58 = vpop.permute.xlu0 %9157  ;;  %v9418_v3 = vsel %vm9404_vm1, %v9283_v63, %v9300_v49 }
 0x4c8   : > { %v9405_v40 = vsel %vm9404_vm1, %v9141_v6, %v9158_v58 }
 0x4ca   : > { %v9317_v2 = vpop.permute.xlu1 %9316 }
 0x4cb   : > { %v9175_v61 = vpop.permute.xlu0 %9174  ;;  %v9419_v41 = vsel %vm9406_vm2, %v9418_v3, %v9317_v2 }
 0x4cc   : > { %v9407_v11 = vsel %vm9406_vm2, %v9405_v40, %v9175_v61 }
 0x4ce   : > { %v9334_v5 = vpop.permute.xlu1 %9333 }
 0x4cf   : > { %v9192_v51 = vpop.permute.xlu0 %9191  ;;  %v9420_v13 = vsel %vm9408_vm3, %v9419_v41, %v9334_v5 }
 0x4d0   : > { %v9409_v56 = vsel %vm9408_vm3, %v9407_v11, %v9192_v51 }
 0x4d2   : > { %v9351_v59 = vpop.permute.xlu1 %9350 }
 0x4d3   : > { %v9209_v52 = vpop.permute.xlu0 %9208  ;;  %v9421_v9 = vsel %vm9410_vm4, %v9420_v13, %v9351_v59 }
 0x4d4   : > { %v9411_v57 = vsel %vm9410_vm4, %v9409_v56, %v9209_v52 }
 0x4d6   : > { %v9368_v54 = vpop.permute.xlu1 %9367 }
 0x4d7   : > { %v9226_v30 = vpop.permute.xlu0 %9225  ;;  %v9422_v8 = vsel %vm9412_vm5, %v9421_v9, %v9368_v54 }
 0x4d8   : > { %v9413_v18 = vsel %vm9412_vm5, %v9411_v57, %v9226_v30 }
 0x4da   : > { %v9385_v10 = vpop.permute.xlu1 %9384 }
 0x4db   : > { %v9243_v15 = vpop.permute.xlu0 %9242  ;;  %v9423_v16 = vsel %vm9414_vm6, %v9422_v8, %v9385_v10 }
 0x4dc   : > { %v9415_v1 = vsel %vm9414_vm6, %v9413_v18, %v9243_v15 }
 0x4de   : > { %v9402_v19 = vpop.permute.xlu1 %9401 }
 0x4df   : > { %v9424_v17 = vsel %vm9416_vm7, %v9423_v16, %v9402_v19  ;;  %v9260_v12 = vpop.permute.xlu0 %9259 }
 0x4e0   : > { %v9428_v7 = vrot.slane %v9424_v17, 4  ;;  %v9417_v55 = vsel %vm9416_vm7, %v9415_v1, %v9260_v12 }
 0x4e1   : > { %v9427_v14 = vrot.slane %v9417_v55, 4 }
 0x4e2   : > { %9432 = vst [vmem:[%s11087_s28 + $0x18] ss:$-12 sps:$4 sm:$0xff] %v9428_v7  }
 0x4e3   : > { %9431 = vst [vmem:[%s11087_s28 + $0x10] ss:$-12 sps:$4 sm:$0xff] %v9427_v14  }
 0x4e4 PF: > { %s19_s27 = sadd.s32 1, %s10550_s27  }
 0x4e5   : > { %p16_p2 = scmp.ge.s32.totalorder %s19_s27, 4  }
 0x4e7   :  { %18 = sbr.rel (!%p16_p2) target bundleno = 1 (0x1), region = 90 }
 0x4ee   :  { %9456 = vsyncpa [#allocation3], 1 }
 0x4ef   :  { %9458 = vsyncpa [#allocation3 + $0x1], 1 }

</bundles_post_ra>
